<compile_context>
chip_gen: v7x
topology: tpu7x:2x2x1
jax: 0.10.0
libtpu: 0.0.40
codegen_flags: <defaults>
</compile_context>

<pallas_src>
import functools
import math

import jax
import jax.numpy as jnp
from jax import lax
from jax.experimental import pallas as pl
from jax.experimental.pallas import tpu as pltpu


def _layernorm(h, w, b, eps=1e-5):
    # single pass: var = E[x^2] - mean^2 (all f32, clamped at 0)
    mu = jnp.mean(h, axis=-1, keepdims=True)
    ms = jnp.mean(h * h, axis=-1, keepdims=True)
    var = jnp.maximum(ms - mu * mu, 0.0)
    return (h - mu) * lax.rsqrt(var + eps) * w + b


def _gelu_tanh(x):
    # GELU(approximate='tanh'): 0.5*x*(1+tanh(sqrt(2/pi)*(x+0.044715*x^3)))
    c = math.sqrt(2.0 / math.pi)
    return 0.5 * x * (1.0 + jnp.tanh(c * (x + 0.044715 * x * x * x)))


def block_kernel(x_ref,
                 ln1w_ref, ln1b_ref,
                 wqkv_ref, bqkv_ref,
                 wattnp_ref, battnp_ref,
                 ln2w_ref, ln2b_ref,
                 wfc_ref, bfc_ref,
                 wproj_ref, bproj_ref,
                 o_ref,
                 qs, ks, vs, ys,
                 *, n_head: int, tile: int, bf16_elt: bool):
    T, C = x_ref.shape
    D = C // n_head
    n_tiles = T // tile
    edt = jnp.bfloat16 if bf16_elt else jnp.float32  # elementwise dtype (exp/GELU)

    ln1w = ln1w_ref[0]
    ln1b = ln1b_ref[0]
    bqkv = bqkv_ref[0]

    # One (tile, tile) causal mask, hoisted; used ONLY on diagonal kv tiles.
    row = lax.broadcasted_iota(jnp.int32, (tile, tile), 0)
    col = lax.broadcasted_iota(jnp.int32, (tile, tile), 1)
    causal_tile = row >= col

    # ---- phase 1: ln_1 + qkv projection (row-tiled); scatter to head-major ----
    def qkv_tile(r, carry):
        r0 = pl.multiple_of(r * tile, tile)
        xb = x_ref[pl.ds(r0, tile), :]                              # (tile, C) f32
        hb = _layernorm(xb, ln1w, ln1b).astype(jnp.bfloat16)
        # NOTE: 1/sqrt(D) already folded into the Q columns of w_qkv / b_qkv.
        qkv = jnp.dot(hb, wqkv_ref[...],
                      preferred_element_type=jnp.float32) + bqkv    # (tile, 3C) f32
        for hh in range(n_head):  # static: store-only, tiny live range
            qs[hh, pl.ds(r0, tile), :] = qkv[:, hh * D:(hh + 1) * D].astype(jnp.bfloat16)
            ks[hh, pl.ds(r0, tile), :] = qkv[:, C + hh * D:C + (hh + 1) * D].astype(jnp.bfloat16)
            vs[hh, pl.ds(r0, tile), :] = qkv[:, 2 * C + hh * D:2 * C + (hh + 1) * D].astype(jnp.bfloat16)
        return carry

    lax.fori_loop(0, n_tiles, qkv_tile, 0)

    # ---- phase 2: causal flash attention, fori over heads / q-tiles / kv-tiles ----
    def head_body(hh, carry_h):
        def q_tile_body(qi, carry_q):
            q0 = pl.multiple_of(qi * tile, tile)
            q_blk = qs[hh, pl.ds(q0, tile), :]                      # (tile, D) bf16

            def kv_step(ki, carry, masked):
                m, l, acc = carry
                k0 = pl.multiple_of(ki * tile, tile)
                k_blk = ks[hh, pl.ds(k0, tile), :]                  # (tile, D) bf16
                v_blk = vs[hh, pl.ds(k0, tile), :]
                # q @ k^T without an explicit transpose: contract last dims.
                s = lax.dot_general(q_blk, k_blk, (((1,), (1,)), ((), ())),
                                    preferred_element_type=jnp.float32)  # (tile, tile) f32
                if masked:  # only the diagonal tile pays for the mask/select
                    s = jnp.where(causal_tile, s, -1e30)
                m_new = jnp.maximum(m, jnp.max(s, axis=-1, keepdims=True))
                alpha = jnp.exp(m - m_new)                          # (tile, 1) f32
                p = jnp.exp((s - m_new).astype(edt))                # bf16 EUP on v6e/v7x
                l_new = alpha * l + jnp.sum(p.astype(jnp.float32), axis=-1, keepdims=True)
                acc_new = alpha * acc + jnp.dot(p.astype(jnp.bfloat16), v_blk,
                                                preferred_element_type=jnp.float32)
                return m_new, l_new, acc_new

            init = (jnp.full((tile, 1), -1e30, jnp.float32),
                    jnp.zeros((tile, 1), jnp.float32),
                    jnp.zeros((tile, D), jnp.float32))
            # Fully-visible kv tiles (ki < qi): no mask, no wasted work on
            # fully-masked tiles (ki > qi) because the loop never visits them.
            m, l, acc = lax.fori_loop(0, qi,
                                      lambda ki, c: kv_step(ki, c, False), init)
            # Diagonal tile: the only one needing the causal mask.
            m, l, acc = kv_step(qi, (m, l, acc), True)

            out = acc * pl.reciprocal(l, approx=True)               # EUP reciprocal
            # Lane-offset-0, head-major store (no odd-lane-offset masked stores).
            ys[hh, pl.ds(q0, tile), :] = out.astype(jnp.bfloat16)
            return carry_q

        lax.fori_loop(0, n_tiles, q_tile_body, 0)
        return carry_h

    lax.fori_loop(0, n_head, head_body, 0)

    # ---- phase 3: attn proj + residual + ln_2 + MLP + residual (row-tiled) ----
    battnp = battnp_ref[0]
    ln2w = ln2w_ref[0]
    ln2b = ln2b_ref[0]
    bfc = bfc_ref[0]
    bproj = bproj_ref[0]

    def out_tile(r, carry):
        r0 = pl.multiple_of(r * tile, tile)
        xb = x_ref[pl.ds(r0, tile), :]                              # (tile, C) f32
        # re-assemble (tile, C) bf16 slab once; keeps the proj matmul fat (K=C)
        y_blk = jnp.concatenate(
            [ys[hh, pl.ds(r0, tile), :] for hh in range(n_head)], axis=-1)
        att = jnp.dot(y_blk, wattnp_ref[...],
                      preferred_element_type=jnp.float32) + battnp
        x1 = xb + att
        h2 = _layernorm(x1, ln2w, ln2b).astype(jnp.bfloat16)
        f = jnp.dot(h2, wfc_ref[...],
                    preferred_element_type=jnp.float32) + bfc       # (tile, 4C) f32
        f = _gelu_tanh(f.astype(edt))                               # bf16 on v6e/v7x
        mo = jnp.dot(f.astype(jnp.bfloat16), wproj_ref[...],
                     preferred_element_type=jnp.float32) + bproj
        o_ref[pl.ds(r0, tile), :] = (x1 + mo).astype(o_ref.dtype)
        return carry

    lax.fori_loop(0, n_tiles, out_tile, 0)


def _device_kind():
    try:
        return jax.devices()[0].device_kind.lower()
    except Exception:
        return ""


def _pick_tile(T):
    # largest divisor of T that is <= 256 (256-multiples feed the v6e/v7x MXU;
    # any multiple of 128 is also fine on v5e).
    for t in (256, 128, 64, 32, 16, 8):
        if T >= t and T % t == 0:
            return t
    return T


def gpt2_block(x, params, n_head):
    B, T, C = x.shape
    assert C % n_head == 0
    D = C // n_head
    tile = _pick_tile(T)
    assert T % tile == 0

    # Fold the attention 1/sqrt(D) scale into the Q columns of c_attn
    # (weights AND bias) on the host - removes per-score scaling in the kernel.
    scale = 1.0 / math.sqrt(D)
    qkv_scale = jnp.concatenate([jnp.full((C,), scale, jnp.float32),
                                 jnp.ones((2 * C,), jnp.float32)])
    w_qkv = (params["w_qkv"] * qkv_scale[None, :]).astype(jnp.bfloat16)
    b_qkv = params["b_qkv"] * qkv_scale[None, :]

    weights = [
        params["ln1_w"], params["ln1_b"],
        w_qkv, b_qkv,
        params["w_attn_proj"].astype(jnp.bfloat16), params["b_attn_proj"],
        params["ln2_w"], params["ln2_b"],
        params["w_fc"].astype(jnp.bfloat16), params["b_fc"],
        params["w_mlp_proj"].astype(jnp.bfloat16), params["b_mlp_proj"],
    ]

    # Device-adaptive knobs: bf16 elementwise only where the VPU/EUP support it
    # (v6e/v7x); tighter VMEM budget on v7x (64 MiB physical per TC).
    kind = _device_kind()
    is_v7 = ("v7" in kind) or ("7x" in kind)
    bf16_elt = is_v7 or ("v6" in kind)
    vmem_limit = (48 if is_v7 else 96) * 1024 * 1024

    # Weights / biases / LN params: whole array resident in VMEM, single-buffered.
    vmem_full = pl.BlockSpec(memory_space=pltpu.MemorySpace.VMEM)

    return pl.pallas_call(
        functools.partial(block_kernel, n_head=n_head, tile=tile, bf16_elt=bf16_elt),
        out_shape=jax.ShapeDtypeStruct((B, T, C), x.dtype),
        grid_spec=pltpu.PrefetchScalarGridSpec(
            num_scalar_prefetch=0,
            grid=(B,),
            in_specs=[pl.BlockSpec((None, T, C), lambda b: (b, 0, 0))]
                     + [vmem_full] * len(weights),
            out_specs=pl.BlockSpec((None, T, C), lambda b: (b, 0, 0)),
            scratch_shapes=[
                pltpu.VMEM((n_head, T, D), jnp.bfloat16),   # Q, head-major
                pltpu.VMEM((n_head, T, D), jnp.bfloat16),   # K, head-major
                pltpu.VMEM((n_head, T, D), jnp.bfloat16),   # V, head-major
                pltpu.VMEM((n_head, T, D), jnp.bfloat16),   # head outputs
            ],
        ),
        compiler_params=pltpu.CompilerParams(
            dimension_semantics=("parallel",),
            vmem_limit_bytes=vmem_limit),
    )(x, *weights)


def init_params(key, n_embd):
    ks = jax.random.split(key, 4)
    std = 0.02
    return {
        # LayerNorm params (PyTorch default: weight=1, bias=0), stored (1, C)
        "ln1_w": jnp.ones((1, n_embd), jnp.float32),
        "ln1_b": jnp.zeros((1, n_embd), jnp.float32),
        "ln2_w": jnp.ones((1, n_embd), jnp.float32),
        "ln2_b": jnp.zeros((1, n_embd), jnp.float32),
        # attention: c_attn (C -> 3C), c_proj (C -> C)
        "w_qkv": (jax.random.normal(ks[0], (n_embd, 3 * n_embd)) * std).astype(jnp.float32),
        "b_qkv": jnp.zeros((1, 3 * n_embd), jnp.float32),
        "w_attn_proj": (jax.random.normal(ks[1], (n_embd, n_embd)) * std).astype(jnp.float32),
        "b_attn_proj": jnp.zeros((1, n_embd), jnp.float32),
        # MLP: c_fc (C -> 4C), c_proj (4C -> C)
        "w_fc": (jax.random.normal(ks[2], (n_embd, 4 * n_embd)) * std).astype(jnp.float32),
        "b_fc": jnp.zeros((1, 4 * n_embd), jnp.float32),
        "w_mlp_proj": (jax.random.normal(ks[3], (4 * n_embd, n_embd)) * std).astype(jnp.float32),
        "b_mlp_proj": jnp.zeros((1, n_embd), jnp.float32),
    }


def reference_block(x, params, n_head):
    """Pure-JAX f32 reference for sanity checking."""
    B, T, C = x.shape
    D = C // n_head

    def ln(h, w, b):
        mu = jnp.mean(h, axis=-1, keepdims=True)
        var = jnp.mean((h - mu) ** 2, axis=-1, keepdims=True)
        return (h - mu) / jnp.sqrt(var + 1e-5) * w[0] + b[0]

    h = ln(x, params["ln1_w"], params["ln1_b"])
    qkv = h @ params["w_qkv"] + params["b_qkv"][0]
    q, k, v = jnp.split(qkv, 3, axis=-1)
    q = q.reshape(B, T, n_head, D).transpose(0, 2, 1, 3)
    k = k.reshape(B, T, n_head, D).transpose(0, 2, 1, 3)
    v = v.reshape(B, T, n_head, D).transpose(0, 2, 1, 3)
    s = jnp.einsum("bhtd,bhsd->bhts", q, k) / math.sqrt(D)
    mask = jnp.tril(jnp.ones((T, T), bool))
    s = jnp.where(mask, s, -1e30)
    p = jax.nn.softmax(s, axis=-1)
    y = jnp.einsum("bhts,bhsd->bhtd", p, v).transpose(0, 2, 1, 3).reshape(B, T, C)
    y = y @ params["w_attn_proj"] + params["b_attn_proj"][0]
    x1 = x + y
    h2 = ln(x1, params["ln2_w"], params["ln2_b"])
    f = h2 @ params["w_fc"] + params["b_fc"][0]
    c = math.sqrt(2.0 / math.pi)
    f = 0.5 * f * (1.0 + jnp.tanh(c * (f + 0.044715 * f ** 3)))
    m = f @ params["w_mlp_proj"] + params["b_mlp_proj"][0]
    return x1 + m


if __name__ == "__main__":
    # Small GPT-2-style config: n_embd=32, n_head=4, seq T=8, batch=2
    B, T, C, H = 2, 8, 32, 4
    key = jax.random.PRNGKey(0)
    kx, kp = jax.random.split(key)
    x = jax.random.normal(kx, (B, T, C), dtype=jnp.float32)
    params = init_params(kp, C)

    out = jax.block_until_ready(gpt2_block(x, params, n_head=H))
    ref = reference_block(x, params, n_head=H)

    assert out.shape == (B, T, C)
    max_err = jnp.max(jnp.abs(out - ref))
    # bf16 matmul operands (+ bf16 exp/GELU on v6e/v7x) + approx reciprocal
    # => loosened tolerance vs f32 reference.
    assert jnp.allclose(out, ref, atol=2e-2, rtol=2e-2), f"max err {max_err}"
    print("KERNEL_OK")
</pallas_src>

<mosaic_0001>
module attributes {stable_mosaic.version = 11 : i64} {
  func.func @block_kernel(%arg0: i32, %arg1: memref<1x8x32xf32, #tpu.memory_space<vmem>>, %arg2: memref<1x32xf32, #tpu.memory_space<vmem>>, %arg3: memref<1x32xf32, #tpu.memory_space<vmem>>, %arg4: memref<32x96xbf16, #tpu.memory_space<vmem>>, %arg5: memref<1x96xf32, #tpu.memory_space<vmem>>, %arg6: memref<32x32xbf16, #tpu.memory_space<vmem>>, %arg7: memref<1x32xf32, #tpu.memory_space<vmem>>, %arg8: memref<1x32xf32, #tpu.memory_space<vmem>>, %arg9: memref<1x32xf32, #tpu.memory_space<vmem>>, %arg10: memref<32x128xbf16, #tpu.memory_space<vmem>>, %arg11: memref<1x128xf32, #tpu.memory_space<vmem>>, %arg12: memref<128x32xbf16, #tpu.memory_space<vmem>>, %arg13: memref<1x32xf32, #tpu.memory_space<vmem>>, %arg14: memref<1x8x32xf32, #tpu.memory_space<vmem>>, %arg15: memref<4x8x8xbf16, #tpu.memory_space<vmem>>, %arg16: memref<4x8x8xbf16, #tpu.memory_space<vmem>>, %arg17: memref<4x8x8xbf16, #tpu.memory_space<vmem>>, %arg18: memref<4x8x8xbf16, #tpu.memory_space<vmem>>) attributes {dimension_semantics = [#tpu.dimension_semantics<parallel>], iteration_bounds = array<i64: 2>, scalar_prefetch = 0 : i64, scratch_operands = 4 : i64, tpu.core_type = #tpu.core_type<tc>, window_params = [{transform_indices = @transform_0, window_bounds = array<i64: 1, 8, 32>}, {pipeline_mode = #tpu.pipeline_mode<synchronous>, transform_indices = @transform_1, window_bounds = array<i64: 1, 32>}, {pipeline_mode = #tpu.pipeline_mode<synchronous>, transform_indices = @transform_2, window_bounds = array<i64: 1, 32>}, {pipeline_mode = #tpu.pipeline_mode<synchronous>, transform_indices = @transform_3, window_bounds = array<i64: 32, 96>}, {pipeline_mode = #tpu.pipeline_mode<synchronous>, transform_indices = @transform_4, window_bounds = array<i64: 1, 96>}, {pipeline_mode = #tpu.pipeline_mode<synchronous>, transform_indices = @transform_5, window_bounds = array<i64: 32, 32>}, {pipeline_mode = #tpu.pipeline_mode<synchronous>, transform_indices = @transform_6, window_bounds = array<i64: 1, 32>}, {pipeline_mode = #tpu.pipeline_mode<synchronous>, transform_indices = @transform_7, window_bounds = array<i64: 1, 32>}, {pipeline_mode = #tpu.pipeline_mode<synchronous>, transform_indices = @transform_8, window_bounds = array<i64: 1, 32>}, {pipeline_mode = #tpu.pipeline_mode<synchronous>, transform_indices = @transform_9, window_bounds = array<i64: 32, 128>}, {pipeline_mode = #tpu.pipeline_mode<synchronous>, transform_indices = @transform_10, window_bounds = array<i64: 1, 128>}, {pipeline_mode = #tpu.pipeline_mode<synchronous>, transform_indices = @transform_11, window_bounds = array<i64: 128, 32>}, {pipeline_mode = #tpu.pipeline_mode<synchronous>, transform_indices = @transform_12, window_bounds = array<i64: 1, 32>}, {transform_indices = @transform_13, window_bounds = array<i64: 1, 8, 32>}]} {
    %c0 = arith.constant 0 : index
    %c0_0 = arith.constant 0 : index
    %0 = vector.load %arg2[%c0, %c0_0] : memref<1x32xf32, #tpu.memory_space<vmem>>, vector<1x32xf32>
    %1 = vector.shape_cast %0 : vector<1x32xf32> to vector<32xf32>
    %c0_1 = arith.constant 0 : index
    %c0_2 = arith.constant 0 : index
    %2 = vector.load %arg3[%c0_1, %c0_2] : memref<1x32xf32, #tpu.memory_space<vmem>>, vector<1x32xf32>
    %3 = vector.shape_cast %2 : vector<1x32xf32> to vector<32xf32>
    %c0_3 = arith.constant 0 : index
    %c0_4 = arith.constant 0 : index
    %4 = vector.load %arg5[%c0_3, %c0_4] : memref<1x96xf32, #tpu.memory_space<vmem>>, vector<1x96xf32>
    %5 = vector.shape_cast %4 : vector<1x96xf32> to vector<96xf32>
    %6 = tpu.iota {dimensions = array<i32: 0>} : vector<8x8xi32>
    %7 = tpu.iota {dimensions = array<i32: 1>} : vector<8x8xi32>
    %8 = arith.cmpi sge, %6, %7 : vector<8x8xi32>
    %c0_i32 = arith.constant 0 : i32
    %c8_i32 = arith.constant 8 : i32
    %9 = arith.muli %c0_i32, %c8_i32 : i32
    %10 = tpu.assume_multiple %9, 8 : i32
    %c0_5 = arith.constant 0 : index
    %11 = arith.index_cast %10 : i32 to index
    %c0_6 = arith.constant 0 : index
    %12 = vector.load %arg1[%c0_5, %11, %c0_6] : memref<1x8x32xf32, #tpu.memory_space<vmem>>, vector<1x8x32xf32>
    %13 = vector.shape_cast %12 : vector<1x8x32xf32> to vector<8x32xf32>
    %cst = arith.constant dense<0.000000e+00> : vector<8xf32>
    %14 = vector.multi_reduction <add>, %13, %cst [1] : vector<8x32xf32> to vector<8xf32>
    %15 = vector.shape_cast %14 : vector<8xf32> to vector<8x1xf32>
    %cst_7 = arith.constant 3.200000e+01 : f32
    %16 = vector.broadcast %cst_7 : f32 to vector<8x1xf32>
    %17 = arith.divf %15, %16 : vector<8x1xf32>
    %18 = arith.mulf %13, %13 : vector<8x32xf32>
    %cst_8 = arith.constant dense<0.000000e+00> : vector<8xf32>
    %19 = vector.multi_reduction <add>, %18, %cst_8 [1] : vector<8x32xf32> to vector<8xf32>
    %20 = vector.shape_cast %19 : vector<8xf32> to vector<8x1xf32>
    %cst_9 = arith.constant 3.200000e+01 : f32
    %21 = vector.broadcast %cst_9 : f32 to vector<8x1xf32>
    %22 = arith.divf %20, %21 : vector<8x1xf32>
    %23 = arith.mulf %17, %17 : vector<8x1xf32>
    %24 = arith.subf %22, %23 : vector<8x1xf32>
    %cst_10 = arith.constant 0.000000e+00 : f32
    %25 = vector.broadcast %cst_10 : f32 to vector<8x1xf32>
    %26 = arith.maximumf %24, %25 : vector<8x1xf32>
    %27 = vector.broadcast %17 : vector<8x1xf32> to vector<8x32xf32>
    %28 = arith.subf %13, %27 : vector<8x32xf32>
    %cst_11 = arith.constant 9.99999974E-6 : f32
    %29 = vector.broadcast %cst_11 : f32 to vector<8x1xf32>
    %30 = arith.addf %26, %29 : vector<8x1xf32>
    %31 = math.rsqrt %30 : vector<8x1xf32>
    %32 = vector.broadcast %31 : vector<8x1xf32> to vector<8x32xf32>
    %33 = arith.mulf %28, %32 : vector<8x32xf32>
    %34 = vector.shape_cast %1 : vector<32xf32> to vector<1x32xf32>
    %35 = vector.broadcast %34 : vector<1x32xf32> to vector<8x32xf32>
    %36 = arith.mulf %33, %35 : vector<8x32xf32>
    %37 = vector.shape_cast %3 : vector<32xf32> to vector<1x32xf32>
    %38 = vector.broadcast %37 : vector<1x32xf32> to vector<8x32xf32>
    %39 = arith.addf %36, %38 : vector<8x32xf32>
    %40 = arith.truncf %39 : vector<8x32xf32> to vector<8x32xbf16>
    %c0_12 = arith.constant 0 : index
    %c0_13 = arith.constant 0 : index
    %41 = vector.load %arg4[%c0_12, %c0_13] : memref<32x96xbf16, #tpu.memory_space<vmem>>, vector<32x96xbf16>
    %cst_14 = arith.constant dense<0.000000e+00> : vector<8x96xf32>
    %42 = tpu.matmul %40, %41, %cst_14 {dimension_numbers = #tpu.dot_dimension_numbers<[1], [0], [0], [1], [0, 0, 1, 1], [], []>} : vector<8x32xbf16>, vector<32x96xbf16>, vector<8x96xf32> -> vector<8x96xf32>
    %43 = vector.shape_cast %5 : vector<96xf32> to vector<1x96xf32>
    %44 = vector.broadcast %43 : vector<1x96xf32> to vector<8x96xf32>
    %45 = arith.addf %42, %44 : vector<8x96xf32>
    %46 = vector.extract_strided_slice %45 {offsets = [0, 0], sizes = [8, 8], strides = [1, 1]} : vector<8x96xf32> to vector<8x8xf32>
    %47 = arith.truncf %46 : vector<8x8xf32> to vector<8x8xbf16>
    %c0_15 = arith.constant 0 : index
    %48 = arith.index_cast %10 : i32 to index
    %c0_16 = arith.constant 0 : index
    %49 = vector.load %arg15[%c0_15, %48, %c0_16] : memref<4x8x8xbf16, #tpu.memory_space<vmem>>, vector<1x8x8xbf16>
    %50 = vector.shape_cast %49 : vector<1x8x8xbf16> to vector<8x8xbf16>
    %51 = vector.shape_cast %47 : vector<8x8xbf16> to vector<1x8x8xbf16>
    tpu.vector_store %arg15[%c0_15, %48, %c0_16], %51 {strides = array<i32>} : memref<4x8x8xbf16, #tpu.memory_space<vmem>>, vector<1x8x8xbf16>,
    %52 = vector.extract_strided_slice %45 {offsets = [0, 32], sizes = [8, 8], strides = [1, 1]} : vector<8x96xf32> to vector<8x8xf32>
    %53 = arith.truncf %52 : vector<8x8xf32> to vector<8x8xbf16>
    %c0_17 = arith.constant 0 : index
    %54 = arith.index_cast %10 : i32 to index
    %c0_18 = arith.constant 0 : index
    %55 = vector.load %arg16[%c0_17, %54, %c0_18] : memref<4x8x8xbf16, #tpu.memory_space<vmem>>, vector<1x8x8xbf16>
    %56 = vector.shape_cast %55 : vector<1x8x8xbf16> to vector<8x8xbf16>
    %57 = vector.shape_cast %53 : vector<8x8xbf16> to vector<1x8x8xbf16>
    tpu.vector_store %arg16[%c0_17, %54, %c0_18], %57 {strides = array<i32>} : memref<4x8x8xbf16, #tpu.memory_space<vmem>>, vector<1x8x8xbf16>,
    %58 = vector.extract_strided_slice %45 {offsets = [0, 64], sizes = [8, 8], strides = [1, 1]} : vector<8x96xf32> to vector<8x8xf32>
    %59 = arith.truncf %58 : vector<8x8xf32> to vector<8x8xbf16>
    %c0_19 = arith.constant 0 : index
    %60 = arith.index_cast %10 : i32 to index
    %c0_20 = arith.constant 0 : index
    %61 = vector.load %arg17[%c0_19, %60, %c0_20] : memref<4x8x8xbf16, #tpu.memory_space<vmem>>, vector<1x8x8xbf16>
    %62 = vector.shape_cast %61 : vector<1x8x8xbf16> to vector<8x8xbf16>
    %63 = vector.shape_cast %59 : vector<8x8xbf16> to vector<1x8x8xbf16>
    tpu.vector_store %arg17[%c0_19, %60, %c0_20], %63 {strides = array<i32>} : memref<4x8x8xbf16, #tpu.memory_space<vmem>>, vector<1x8x8xbf16>,
    %64 = vector.extract_strided_slice %45 {offsets = [0, 8], sizes = [8, 8], strides = [1, 1]} : vector<8x96xf32> to vector<8x8xf32>
    %65 = arith.truncf %64 : vector<8x8xf32> to vector<8x8xbf16>
    %c1 = arith.constant 1 : index
    %66 = arith.index_cast %10 : i32 to index
    %c0_21 = arith.constant 0 : index
    %67 = vector.load %arg15[%c1, %66, %c0_21] : memref<4x8x8xbf16, #tpu.memory_space<vmem>>, vector<1x8x8xbf16>
    %68 = vector.shape_cast %67 : vector<1x8x8xbf16> to vector<8x8xbf16>
    %69 = vector.shape_cast %65 : vector<8x8xbf16> to vector<1x8x8xbf16>
    tpu.vector_store %arg15[%c1, %66, %c0_21], %69 {strides = array<i32>} : memref<4x8x8xbf16, #tpu.memory_space<vmem>>, vector<1x8x8xbf16>,
    %70 = vector.extract_strided_slice %45 {offsets = [0, 40], sizes = [8, 8], strides = [1, 1]} : vector<8x96xf32> to vector<8x8xf32>
    %71 = arith.truncf %70 : vector<8x8xf32> to vector<8x8xbf16>
    %c1_22 = arith.constant 1 : index
    %72 = arith.index_cast %10 : i32 to index
    %c0_23 = arith.constant 0 : index
    %73 = vector.load %arg16[%c1_22, %72, %c0_23] : memref<4x8x8xbf16, #tpu.memory_space<vmem>>, vector<1x8x8xbf16>
    %74 = vector.shape_cast %73 : vector<1x8x8xbf16> to vector<8x8xbf16>
    %75 = vector.shape_cast %71 : vector<8x8xbf16> to vector<1x8x8xbf16>
    tpu.vector_store %arg16[%c1_22, %72, %c0_23], %75 {strides = array<i32>} : memref<4x8x8xbf16, #tpu.memory_space<vmem>>, vector<1x8x8xbf16>,
    %76 = vector.extract_strided_slice %45 {offsets = [0, 72], sizes = [8, 8], strides = [1, 1]} : vector<8x96xf32> to vector<8x8xf32>
    %77 = arith.truncf %76 : vector<8x8xf32> to vector<8x8xbf16>
    %c1_24 = arith.constant 1 : index
    %78 = arith.index_cast %10 : i32 to index
    %c0_25 = arith.constant 0 : index
    %79 = vector.load %arg17[%c1_24, %78, %c0_25] : memref<4x8x8xbf16, #tpu.memory_space<vmem>>, vector<1x8x8xbf16>
    %80 = vector.shape_cast %79 : vector<1x8x8xbf16> to vector<8x8xbf16>
    %81 = vector.shape_cast %77 : vector<8x8xbf16> to vector<1x8x8xbf16>
    tpu.vector_store %arg17[%c1_24, %78, %c0_25], %81 {strides = array<i32>} : memref<4x8x8xbf16, #tpu.memory_space<vmem>>, vector<1x8x8xbf16>,
    %82 = vector.extract_strided_slice %45 {offsets = [0, 16], sizes = [8, 8], strides = [1, 1]} : vector<8x96xf32> to vector<8x8xf32>
    %83 = arith.truncf %82 : vector<8x8xf32> to vector<8x8xbf16>
    %c2 = arith.constant 2 : index
    %84 = arith.index_cast %10 : i32 to index
    %c0_26 = arith.constant 0 : index
    %85 = vector.load %arg15[%c2, %84, %c0_26] : memref<4x8x8xbf16, #tpu.memory_space<vmem>>, vector<1x8x8xbf16>
    %86 = vector.shape_cast %85 : vector<1x8x8xbf16> to vector<8x8xbf16>
    %87 = vector.shape_cast %83 : vector<8x8xbf16> to vector<1x8x8xbf16>
    tpu.vector_store %arg15[%c2, %84, %c0_26], %87 {strides = array<i32>} : memref<4x8x8xbf16, #tpu.memory_space<vmem>>, vector<1x8x8xbf16>,
    %88 = vector.extract_strided_slice %45 {offsets = [0, 48], sizes = [8, 8], strides = [1, 1]} : vector<8x96xf32> to vector<8x8xf32>
    %89 = arith.truncf %88 : vector<8x8xf32> to vector<8x8xbf16>
    %c2_27 = arith.constant 2 : index
    %90 = arith.index_cast %10 : i32 to index
    %c0_28 = arith.constant 0 : index
    %91 = vector.load %arg16[%c2_27, %90, %c0_28] : memref<4x8x8xbf16, #tpu.memory_space<vmem>>, vector<1x8x8xbf16>
    %92 = vector.shape_cast %91 : vector<1x8x8xbf16> to vector<8x8xbf16>
    %93 = vector.shape_cast %89 : vector<8x8xbf16> to vector<1x8x8xbf16>
    tpu.vector_store %arg16[%c2_27, %90, %c0_28], %93 {strides = array<i32>} : memref<4x8x8xbf16, #tpu.memory_space<vmem>>, vector<1x8x8xbf16>,
    %94 = vector.extract_strided_slice %45 {offsets = [0, 80], sizes = [8, 8], strides = [1, 1]} : vector<8x96xf32> to vector<8x8xf32>
    %95 = arith.truncf %94 : vector<8x8xf32> to vector<8x8xbf16>
    %c2_29 = arith.constant 2 : index
    %96 = arith.index_cast %10 : i32 to index
    %c0_30 = arith.constant 0 : index
    %97 = vector.load %arg17[%c2_29, %96, %c0_30] : memref<4x8x8xbf16, #tpu.memory_space<vmem>>, vector<1x8x8xbf16>
    %98 = vector.shape_cast %97 : vector<1x8x8xbf16> to vector<8x8xbf16>
    %99 = vector.shape_cast %95 : vector<8x8xbf16> to vector<1x8x8xbf16>
    tpu.vector_store %arg17[%c2_29, %96, %c0_30], %99 {strides = array<i32>} : memref<4x8x8xbf16, #tpu.memory_space<vmem>>, vector<1x8x8xbf16>,
    %100 = vector.extract_strided_slice %45 {offsets = [0, 24], sizes = [8, 8], strides = [1, 1]} : vector<8x96xf32> to vector<8x8xf32>
    %101 = arith.truncf %100 : vector<8x8xf32> to vector<8x8xbf16>
    %c3 = arith.constant 3 : index
    %102 = arith.index_cast %10 : i32 to index
    %c0_31 = arith.constant 0 : index
    %103 = vector.load %arg15[%c3, %102, %c0_31] : memref<4x8x8xbf16, #tpu.memory_space<vmem>>, vector<1x8x8xbf16>
    %104 = vector.shape_cast %103 : vector<1x8x8xbf16> to vector<8x8xbf16>
    %105 = vector.shape_cast %101 : vector<8x8xbf16> to vector<1x8x8xbf16>
    tpu.vector_store %arg15[%c3, %102, %c0_31], %105 {strides = array<i32>} : memref<4x8x8xbf16, #tpu.memory_space<vmem>>, vector<1x8x8xbf16>,
    %106 = vector.extract_strided_slice %45 {offsets = [0, 56], sizes = [8, 8], strides = [1, 1]} : vector<8x96xf32> to vector<8x8xf32>
    %107 = arith.truncf %106 : vector<8x8xf32> to vector<8x8xbf16>
    %c3_32 = arith.constant 3 : index
    %108 = arith.index_cast %10 : i32 to index
    %c0_33 = arith.constant 0 : index
    %109 = vector.load %arg16[%c3_32, %108, %c0_33] : memref<4x8x8xbf16, #tpu.memory_space<vmem>>, vector<1x8x8xbf16>
    %110 = vector.shape_cast %109 : vector<1x8x8xbf16> to vector<8x8xbf16>
    %111 = vector.shape_cast %107 : vector<8x8xbf16> to vector<1x8x8xbf16>
    tpu.vector_store %arg16[%c3_32, %108, %c0_33], %111 {strides = array<i32>} : memref<4x8x8xbf16, #tpu.memory_space<vmem>>, vector<1x8x8xbf16>,
    %112 = vector.extract_strided_slice %45 {offsets = [0, 88], sizes = [8, 8], strides = [1, 1]} : vector<8x96xf32> to vector<8x8xf32>
    %113 = arith.truncf %112 : vector<8x8xf32> to vector<8x8xbf16>
    %c3_34 = arith.constant 3 : index
    %114 = arith.index_cast %10 : i32 to index
    %c0_35 = arith.constant 0 : index
    %115 = vector.load %arg17[%c3_34, %114, %c0_35] : memref<4x8x8xbf16, #tpu.memory_space<vmem>>, vector<1x8x8xbf16>
    %116 = vector.shape_cast %115 : vector<1x8x8xbf16> to vector<8x8xbf16>
    %117 = vector.shape_cast %113 : vector<8x8xbf16> to vector<1x8x8xbf16>
    tpu.vector_store %arg17[%c3_34, %114, %c0_35], %117 {strides = array<i32>} : memref<4x8x8xbf16, #tpu.memory_space<vmem>>, vector<1x8x8xbf16>,
    %c1_i32 = arith.constant 1 : i32
    %c0_i32_36 = arith.constant 0 : i32
    %c4_i32 = arith.constant 4 : i32
    %118 = arith.addi %c0_i32_36, %c4_i32 : i32
    %c1_i32_37 = arith.constant 1 : i32
    scf.for %arg19 = %c0_i32_36 to %118 step %c1_i32_37  : i32 {
      %c0_i32_83 = arith.constant 0 : i32
      %c8_i32_84 = arith.constant 8 : i32
      %209 = arith.muli %c0_i32_83, %c8_i32_84 : i32
      %210 = tpu.assume_multiple %209, 8 : i32
      %211 = arith.index_cast %arg19 : i32 to index
      %212 = arith.index_cast %210 : i32 to index
      %c0_85 = arith.constant 0 : index
      %213 = vector.load %arg15[%211, %212, %c0_85] : memref<4x8x8xbf16, #tpu.memory_space<vmem>>, vector<1x8x8xbf16>
      %214 = vector.shape_cast %213 : vector<1x8x8xbf16> to vector<8x8xbf16>
      %cst_86 = arith.constant -1.000000e+30 : f32
      %215 = vector.broadcast %cst_86 : f32 to vector<8x1xf32>
      %cst_87 = arith.constant 0.000000e+00 : f32
      %216 = vector.broadcast %cst_87 : f32 to vector<8x1xf32>
      %cst_88 = arith.constant 0.000000e+00 : f32
      %217 = vector.broadcast %cst_88 : f32 to vector<8x8xf32>
      %c0_i32_89 = arith.constant 0 : i32
      %218 = arith.subi %c0_i32_83, %c0_i32_89 : i32
      %219 = arith.addi %c0_i32_89, %218 : i32
      %c1_i32_90 = arith.constant 1 : i32
      %220:3 = scf.for %arg20 = %c0_i32_89 to %219 step %c1_i32_90 iter_args(%arg21 = %215, %arg22 = %216, %arg23 = %217) -> (vector<8x1xf32>, vector<8x1xf32>, vector<8x8xf32>)  : i32 {
        %c8_i32_101 = arith.constant 8 : i32
        %260 = arith.muli %arg20, %c8_i32_101 : i32
        %261 = tpu.assume_multiple %260, 8 : i32
        %262 = arith.index_cast %arg19 : i32 to index
        %263 = arith.index_cast %261 : i32 to index
        %c0_102 = arith.constant 0 : index
        %264 = vector.load %arg16[%262, %263, %c0_102] : memref<4x8x8xbf16, #tpu.memory_space<vmem>>, vector<1x8x8xbf16>
        %265 = vector.shape_cast %264 : vector<1x8x8xbf16> to vector<8x8xbf16>
        %266 = arith.index_cast %arg19 : i32 to index
        %267 = arith.index_cast %261 : i32 to index
        %c0_103 = arith.constant 0 : index
        %268 = vector.load %arg17[%266, %267, %c0_103] : memref<4x8x8xbf16, #tpu.memory_space<vmem>>, vector<1x8x8xbf16>
        %269 = vector.shape_cast %268 : vector<1x8x8xbf16> to vector<8x8xbf16>
        %cst_104 = arith.constant dense<0.000000e+00> : vector<8x8xf32>
        %270 = tpu.matmul %214, %265, %cst_104 {dimension_numbers = #tpu.dot_dimension_numbers<[1], [1], [0], [0], [0, 0, 1, 0], [], []>} : vector<8x8xbf16>, vector<8x8xbf16>, vector<8x8xf32> -> vector<8x8xf32>
        %cst_105 = arith.constant dense<0xFF800000> : vector<8xf32>
        %271 = vector.multi_reduction <maximumf>, %270, %cst_105 [1] : vector<8x8xf32> to vector<8xf32>
        %272 = vector.shape_cast %271 : vector<8xf32> to vector<8x1xf32>
        %273 = arith.maximumf %arg21, %272 : vector<8x1xf32>
        %274 = arith.subf %arg21, %273 : vector<8x1xf32>
        %275 = math.exp %274 : vector<8x1xf32>
        %276 = vector.broadcast %273 : vector<8x1xf32> to vector<8x8xf32>
        %277 = arith.subf %270, %276 : vector<8x8xf32>
        %278 = math.exp %277 : vector<8x8xf32>
        %279 = arith.mulf %275, %arg22 : vector<8x1xf32>
        %cst_106 = arith.constant dense<0.000000e+00> : vector<8xf32>
        %280 = vector.multi_reduction <add>, %278, %cst_106 [1] : vector<8x8xf32> to vector<8xf32>
        %281 = vector.shape_cast %280 : vector<8xf32> to vector<8x1xf32>
        %282 = arith.addf %279, %281 : vector<8x1xf32>
        %283 = vector.broadcast %275 : vector<8x1xf32> to vector<8x8xf32>
        %284 = arith.mulf %283, %arg23 : vector<8x8xf32>
        %285 = arith.truncf %278 : vector<8x8xf32> to vector<8x8xbf16>
        %cst_107 = arith.constant dense<0.000000e+00> : vector<8x8xf32>
        %286 = tpu.matmul %285, %269, %cst_107 {dimension_numbers = #tpu.dot_dimension_numbers<[1], [0], [0], [1], [0, 0, 1, 1], [], []>} : vector<8x8xbf16>, vector<8x8xbf16>, vector<8x8xf32> -> vector<8x8xf32>
        %287 = arith.addf %284, %286 : vector<8x8xf32>
        scf.yield %273, %282, %287 : vector<8x1xf32>, vector<8x1xf32>, vector<8x8xf32>
      }
      %c8_i32_91 = arith.constant 8 : i32
      %221 = arith.muli %c0_i32_83, %c8_i32_91 : i32
      %222 = tpu.assume_multiple %221, 8 : i32
      %223 = arith.index_cast %arg19 : i32 to index
      %224 = arith.index_cast %222 : i32 to index
      %c0_92 = arith.constant 0 : index
      %225 = vector.load %arg16[%223, %224, %c0_92] : memref<4x8x8xbf16, #tpu.memory_space<vmem>>, vector<1x8x8xbf16>
      %226 = vector.shape_cast %225 : vector<1x8x8xbf16> to vector<8x8xbf16>
      %227 = arith.index_cast %arg19 : i32 to index
      %228 = arith.index_cast %222 : i32 to index
      %c0_93 = arith.constant 0 : index
      %229 = vector.load %arg17[%227, %228, %c0_93] : memref<4x8x8xbf16, #tpu.memory_space<vmem>>, vector<1x8x8xbf16>
      %230 = vector.shape_cast %229 : vector<1x8x8xbf16> to vector<8x8xbf16>
      %cst_94 = arith.constant dense<0.000000e+00> : vector<8x8xf32>
      %231 = tpu.matmul %214, %226, %cst_94 {dimension_numbers = #tpu.dot_dimension_numbers<[1], [1], [0], [0], [0, 0, 1, 0], [], []>} : vector<8x8xbf16>, vector<8x8xbf16>, vector<8x8xf32> -> vector<8x8xf32>
      %cst_95 = arith.constant -1.000000e+30 : f32
      %232 = vector.broadcast %cst_95 : f32 to vector<8x8xf32>
      %233 = arith.select %8, %231, %232 : vector<8x8xi1>, vector<8x8xf32>
      %cst_96 = arith.constant dense<0xFF800000> : vector<8xf32>
      %234 = vector.multi_reduction <maximumf>, %233, %cst_96 [1] : vector<8x8xf32> to vector<8xf32>
      %235 = vector.shape_cast %234 : vector<8xf32> to vector<8x1xf32>
      %236 = arith.maximumf %220#0, %235 : vector<8x1xf32>
      %237 = arith.subf %220#0, %236 : vector<8x1xf32>
      %238 = math.exp %237 : vector<8x1xf32>
      %239 = vector.broadcast %236 : vector<8x1xf32> to vector<8x8xf32>
      %240 = arith.subf %233, %239 : vector<8x8xf32>
      %241 = math.exp %240 : vector<8x8xf32>
      %242 = arith.mulf %238, %220#1 : vector<8x1xf32>
      %cst_97 = arith.constant dense<0.000000e+00> : vector<8xf32>
      %243 = vector.multi_reduction <add>, %241, %cst_97 [1] : vector<8x8xf32> to vector<8xf32>
      %244 = vector.shape_cast %243 : vector<8xf32> to vector<8x1xf32>
      %245 = arith.addf %242, %244 : vector<8x1xf32>
      %246 = vector.broadcast %238 : vector<8x1xf32> to vector<8x8xf32>
      %247 = arith.mulf %246, %220#2 : vector<8x8xf32>
      %248 = arith.truncf %241 : vector<8x8xf32> to vector<8x8xbf16>
      %cst_98 = arith.constant dense<0.000000e+00> : vector<8x8xf32>
      %249 = tpu.matmul %248, %230, %cst_98 {dimension_numbers = #tpu.dot_dimension_numbers<[1], [0], [0], [1], [0, 0, 1, 1], [], []>} : vector<8x8xbf16>, vector<8x8xbf16>, vector<8x8xf32> -> vector<8x8xf32>
      %250 = arith.addf %247, %249 : vector<8x8xf32>
      %251 = tpu.reciprocal %245 {approx = true} : vector<8x1xf32> -> vector<8x1xf32>
      %252 = vector.broadcast %251 : vector<8x1xf32> to vector<8x8xf32>
      %253 = arith.mulf %250, %252 : vector<8x8xf32>
      %254 = arith.truncf %253 : vector<8x8xf32> to vector<8x8xbf16>
      %255 = arith.index_cast %arg19 : i32 to index
      %256 = arith.index_cast %210 : i32 to index
      %c0_99 = arith.constant 0 : index
      %257 = vector.load %arg18[%255, %256, %c0_99] : memref<4x8x8xbf16, #tpu.memory_space<vmem>>, vector<1x8x8xbf16>
      %258 = vector.shape_cast %257 : vector<1x8x8xbf16> to vector<8x8xbf16>
      %259 = vector.shape_cast %254 : vector<8x8xbf16> to vector<1x8x8xbf16>
      tpu.vector_store %arg18[%255, %256, %c0_99], %259 {strides = array<i32>} : memref<4x8x8xbf16, #tpu.memory_space<vmem>>, vector<1x8x8xbf16>,
      %c1_i32_100 = arith.constant 1 : i32
    }
    %c4_i32_38 = arith.constant 4 : i32
    %c0_39 = arith.constant 0 : index
    %c0_40 = arith.constant 0 : index
    %119 = vector.load %arg7[%c0_39, %c0_40] : memref<1x32xf32, #tpu.memory_space<vmem>>, vector<1x32xf32>
    %120 = vector.shape_cast %119 : vector<1x32xf32> to vector<32xf32>
    %c0_41 = arith.constant 0 : index
    %c0_42 = arith.constant 0 : index
    %121 = vector.load %arg8[%c0_41, %c0_42] : memref<1x32xf32, #tpu.memory_space<vmem>>, vector<1x32xf32>
    %122 = vector.shape_cast %121 : vector<1x32xf32> to vector<32xf32>
    %c0_43 = arith.constant 0 : index
    %c0_44 = arith.constant 0 : index
    %123 = vector.load %arg9[%c0_43, %c0_44] : memref<1x32xf32, #tpu.memory_space<vmem>>, vector<1x32xf32>
    %124 = vector.shape_cast %123 : vector<1x32xf32> to vector<32xf32>
    %c0_45 = arith.constant 0 : index
    %c0_46 = arith.constant 0 : index
    %125 = vector.load %arg11[%c0_45, %c0_46] : memref<1x128xf32, #tpu.memory_space<vmem>>, vector<1x128xf32>
    %126 = vector.shape_cast %125 : vector<1x128xf32> to vector<128xf32>
    %c0_47 = arith.constant 0 : index
    %c0_48 = arith.constant 0 : index
    %127 = vector.load %arg13[%c0_47, %c0_48] : memref<1x32xf32, #tpu.memory_space<vmem>>, vector<1x32xf32>
    %128 = vector.shape_cast %127 : vector<1x32xf32> to vector<32xf32>
    %c0_i32_49 = arith.constant 0 : i32
    %c8_i32_50 = arith.constant 8 : i32
    %129 = arith.muli %c0_i32_49, %c8_i32_50 : i32
    %130 = tpu.assume_multiple %129, 8 : i32
    %c0_51 = arith.constant 0 : index
    %131 = arith.index_cast %130 : i32 to index
    %c0_52 = arith.constant 0 : index
    %132 = vector.load %arg1[%c0_51, %131, %c0_52] : memref<1x8x32xf32, #tpu.memory_space<vmem>>, vector<1x8x32xf32>
    %133 = vector.shape_cast %132 : vector<1x8x32xf32> to vector<8x32xf32>
    %c0_53 = arith.constant 0 : index
    %134 = arith.index_cast %130 : i32 to index
    %c0_54 = arith.constant 0 : index
    %135 = vector.load %arg18[%c0_53, %134, %c0_54] : memref<4x8x8xbf16, #tpu.memory_space<vmem>>, vector<1x8x8xbf16>
    %136 = vector.shape_cast %135 : vector<1x8x8xbf16> to vector<8x8xbf16>
    %c1_55 = arith.constant 1 : index
    %137 = arith.index_cast %130 : i32 to index
    %c0_56 = arith.constant 0 : index
    %138 = vector.load %arg18[%c1_55, %137, %c0_56] : memref<4x8x8xbf16, #tpu.memory_space<vmem>>, vector<1x8x8xbf16>
    %139 = vector.shape_cast %138 : vector<1x8x8xbf16> to vector<8x8xbf16>
    %c2_57 = arith.constant 2 : index
    %140 = arith.index_cast %130 : i32 to index
    %c0_58 = arith.constant 0 : index
    %141 = vector.load %arg18[%c2_57, %140, %c0_58] : memref<4x8x8xbf16, #tpu.memory_space<vmem>>, vector<1x8x8xbf16>
    %142 = vector.shape_cast %141 : vector<1x8x8xbf16> to vector<8x8xbf16>
    %c3_59 = arith.constant 3 : index
    %143 = arith.index_cast %130 : i32 to index
    %c0_60 = arith.constant 0 : index
    %144 = vector.load %arg18[%c3_59, %143, %c0_60] : memref<4x8x8xbf16, #tpu.memory_space<vmem>>, vector<1x8x8xbf16>
    %145 = vector.shape_cast %144 : vector<1x8x8xbf16> to vector<8x8xbf16>
    %146 = tpu.concatenate %136, %139, %142, %145 in 1 : vector<8x8xbf16>, vector<8x8xbf16>, vector<8x8xbf16>, vector<8x8xbf16> -> vector<8x32xbf16>
    %c0_61 = arith.constant 0 : index
    %c0_62 = arith.constant 0 : index
    %147 = vector.load %arg6[%c0_61, %c0_62] : memref<32x32xbf16, #tpu.memory_space<vmem>>, vector<32x32xbf16>
    %cst_63 = arith.constant dense<0.000000e+00> : vector<8x32xf32>
    %148 = tpu.matmul %146, %147, %cst_63 {dimension_numbers = #tpu.dot_dimension_numbers<[1], [0], [0], [1], [0, 0, 1, 1], [], []>} : vector<8x32xbf16>, vector<32x32xbf16>, vector<8x32xf32> -> vector<8x32xf32>
    %149 = vector.shape_cast %120 : vector<32xf32> to vector<1x32xf32>
    %150 = vector.broadcast %149 : vector<1x32xf32> to vector<8x32xf32>
    %151 = arith.addf %148, %150 : vector<8x32xf32>
    %152 = arith.addf %133, %151 : vector<8x32xf32>
    %cst_64 = arith.constant dense<0.000000e+00> : vector<8xf32>
    %153 = vector.multi_reduction <add>, %152, %cst_64 [1] : vector<8x32xf32> to vector<8xf32>
    %154 = vector.shape_cast %153 : vector<8xf32> to vector<8x1xf32>
    %cst_65 = arith.constant 3.200000e+01 : f32
    %155 = vector.broadcast %cst_65 : f32 to vector<8x1xf32>
    %156 = arith.divf %154, %155 : vector<8x1xf32>
    %157 = arith.mulf %152, %152 : vector<8x32xf32>
    %cst_66 = arith.constant dense<0.000000e+00> : vector<8xf32>
    %158 = vector.multi_reduction <add>, %157, %cst_66 [1] : vector<8x32xf32> to vector<8xf32>
    %159 = vector.shape_cast %158 : vector<8xf32> to vector<8x1xf32>
    %cst_67 = arith.constant 3.200000e+01 : f32
    %160 = vector.broadcast %cst_67 : f32 to vector<8x1xf32>
    %161 = arith.divf %159, %160 : vector<8x1xf32>
    %162 = arith.mulf %156, %156 : vector<8x1xf32>
    %163 = arith.subf %161, %162 : vector<8x1xf32>
    %cst_68 = arith.constant 0.000000e+00 : f32
    %164 = vector.broadcast %cst_68 : f32 to vector<8x1xf32>
    %165 = arith.maximumf %163, %164 : vector<8x1xf32>
    %166 = vector.broadcast %156 : vector<8x1xf32> to vector<8x32xf32>
    %167 = arith.subf %152, %166 : vector<8x32xf32>
    %cst_69 = arith.constant 9.99999974E-6 : f32
    %168 = vector.broadcast %cst_69 : f32 to vector<8x1xf32>
    %169 = arith.addf %165, %168 : vector<8x1xf32>
    %170 = math.rsqrt %169 : vector<8x1xf32>
    %171 = vector.broadcast %170 : vector<8x1xf32> to vector<8x32xf32>
    %172 = arith.mulf %167, %171 : vector<8x32xf32>
    %173 = vector.shape_cast %122 : vector<32xf32> to vector<1x32xf32>
    %174 = vector.broadcast %173 : vector<1x32xf32> to vector<8x32xf32>
    %175 = arith.mulf %172, %174 : vector<8x32xf32>
    %176 = vector.shape_cast %124 : vector<32xf32> to vector<1x32xf32>
    %177 = vector.broadcast %176 : vector<1x32xf32> to vector<8x32xf32>
    %178 = arith.addf %175, %177 : vector<8x32xf32>
    %179 = arith.truncf %178 : vector<8x32xf32> to vector<8x32xbf16>
    %c0_70 = arith.constant 0 : index
    %c0_71 = arith.constant 0 : index
    %180 = vector.load %arg10[%c0_70, %c0_71] : memref<32x128xbf16, #tpu.memory_space<vmem>>, vector<32x128xbf16>
    %cst_72 = arith.constant dense<0.000000e+00> : vector<8x128xf32>
    %181 = tpu.matmul %179, %180, %cst_72 {dimension_numbers = #tpu.dot_dimension_numbers<[1], [0], [0], [1], [0, 0, 1, 1], [], []>} : vector<8x32xbf16>, vector<32x128xbf16>, vector<8x128xf32> -> vector<8x128xf32>
    %182 = vector.shape_cast %126 : vector<128xf32> to vector<1x128xf32>
    %183 = vector.broadcast %182 : vector<1x128xf32> to vector<8x128xf32>
    %184 = arith.addf %181, %183 : vector<8x128xf32>
    %cst_73 = arith.constant 5.000000e-01 : f32
    %185 = vector.broadcast %cst_73 : f32 to vector<8x128xf32>
    %186 = arith.mulf %185, %184 : vector<8x128xf32>
    %cst_74 = arith.constant 4.471500e-02 : f32
    %187 = vector.broadcast %cst_74 : f32 to vector<8x128xf32>
    %188 = arith.mulf %187, %184 : vector<8x128xf32>
    %189 = arith.mulf %188, %184 : vector<8x128xf32>
    %190 = arith.mulf %189, %184 : vector<8x128xf32>
    %191 = arith.addf %184, %190 : vector<8x128xf32>
    %cst_75 = arith.constant 0.797884583 : f32
    %192 = vector.broadcast %cst_75 : f32 to vector<8x128xf32>
    %193 = arith.mulf %192, %191 : vector<8x128xf32>
    %194 = math.tanh %193 : vector<8x128xf32>
    %cst_76 = arith.constant 1.000000e+00 : f32
    %195 = vector.broadcast %cst_76 : f32 to vector<8x128xf32>
    %196 = arith.addf %195, %194 : vector<8x128xf32>
    %197 = arith.mulf %186, %196 : vector<8x128xf32>
    %198 = arith.truncf %197 : vector<8x128xf32> to vector<8x128xbf16>
    %c0_77 = arith.constant 0 : index
    %c0_78 = arith.constant 0 : index
    %199 = vector.load %arg12[%c0_77, %c0_78] : memref<128x32xbf16, #tpu.memory_space<vmem>>, vector<128x32xbf16>
    %cst_79 = arith.constant dense<0.000000e+00> : vector<8x32xf32>
    %200 = tpu.matmul %198, %199, %cst_79 {dimension_numbers = #tpu.dot_dimension_numbers<[1], [0], [0], [1], [0, 0, 1, 1], [], []>} : vector<8x128xbf16>, vector<128x32xbf16>, vector<8x32xf32> -> vector<8x32xf32>
    %201 = vector.shape_cast %128 : vector<32xf32> to vector<1x32xf32>
    %202 = vector.broadcast %201 : vector<1x32xf32> to vector<8x32xf32>
    %203 = arith.addf %200, %202 : vector<8x32xf32>
    %204 = arith.addf %152, %203 : vector<8x32xf32>
    %c0_80 = arith.constant 0 : index
    %205 = arith.index_cast %130 : i32 to index
    %c0_81 = arith.constant 0 : index
    %206 = vector.load %arg14[%c0_80, %205, %c0_81] : memref<1x8x32xf32, #tpu.memory_space<vmem>>, vector<1x8x32xf32>
    %207 = vector.shape_cast %206 : vector<1x8x32xf32> to vector<8x32xf32>
    %208 = vector.shape_cast %204 : vector<8x32xf32> to vector<1x8x32xf32>
    tpu.vector_store %arg14[%c0_80, %205, %c0_81], %208 {strides = array<i32>} : memref<1x8x32xf32, #tpu.memory_space<vmem>>, vector<1x8x32xf32>,
    %c1_i32_82 = arith.constant 1 : i32
    return
  }
  func.func @transform_0(%arg0: i32) -> (i32, i32, i32) {
    %c0_i32 = arith.constant 0 : i32
    %c0_i32_0 = arith.constant 0 : i32
    %c0_i32_1 = arith.constant 0 : i32
    return %arg0, %c0_i32, %c0_i32_0 : i32, i32, i32
  }
  func.func @transform_1(%arg0: i32) -> (i32, i32) {
    %c0_i32 = arith.constant 0 : i32
    %c0_i32_0 = arith.constant 0 : i32
    %c0_i32_1 = arith.constant 0 : i32
    return %c0_i32, %c0_i32_0 : i32, i32
  }
  func.func @transform_2(%arg0: i32) -> (i32, i32) {
    %c0_i32 = arith.constant 0 : i32
    %c0_i32_0 = arith.constant 0 : i32
    %c0_i32_1 = arith.constant 0 : i32
    return %c0_i32, %c0_i32_0 : i32, i32
  }
  func.func @transform_3(%arg0: i32) -> (i32, i32) {
    %c0_i32 = arith.constant 0 : i32
    %c0_i32_0 = arith.constant 0 : i32
    %c0_i32_1 = arith.constant 0 : i32
    return %c0_i32, %c0_i32_0 : i32, i32
  }
  func.func @transform_4(%arg0: i32) -> (i32, i32) {
    %c0_i32 = arith.constant 0 : i32
    %c0_i32_0 = arith.constant 0 : i32
    %c0_i32_1 = arith.constant 0 : i32
    return %c0_i32, %c0_i32_0 : i32, i32
  }
  func.func @transform_5(%arg0: i32) -> (i32, i32) {
    %c0_i32 = arith.constant 0 : i32
    %c0_i32_0 = arith.constant 0 : i32
    %c0_i32_1 = arith.constant 0 : i32
    return %c0_i32, %c0_i32_0 : i32, i32
  }
  func.func @transform_6(%arg0: i32) -> (i32, i32) {
    %c0_i32 = arith.constant 0 : i32
    %c0_i32_0 = arith.constant 0 : i32
    %c0_i32_1 = arith.constant 0 : i32
    return %c0_i32, %c0_i32_0 : i32, i32
  }
  func.func @transform_7(%arg0: i32) -> (i32, i32) {
    %c0_i32 = arith.constant 0 : i32
    %c0_i32_0 = arith.constant 0 : i32
    %c0_i32_1 = arith.constant 0 : i32
    return %c0_i32, %c0_i32_0 : i32, i32
  }
  func.func @transform_8(%arg0: i32) -> (i32, i32) {
    %c0_i32 = arith.constant 0 : i32
    %c0_i32_0 = arith.constant 0 : i32
    %c0_i32_1 = arith.constant 0 : i32
    return %c0_i32, %c0_i32_0 : i32, i32
  }
  func.func @transform_9(%arg0: i32) -> (i32, i32) {
    %c0_i32 = arith.constant 0 : i32
    %c0_i32_0 = arith.constant 0 : i32
    %c0_i32_1 = arith.constant 0 : i32
    return %c0_i32, %c0_i32_0 : i32, i32
  }
  func.func @transform_10(%arg0: i32) -> (i32, i32) {
    %c0_i32 = arith.constant 0 : i32
    %c0_i32_0 = arith.constant 0 : i32
    %c0_i32_1 = arith.constant 0 : i32
    return %c0_i32, %c0_i32_0 : i32, i32
  }
  func.func @transform_11(%arg0: i32) -> (i32, i32) {
    %c0_i32 = arith.constant 0 : i32
    %c0_i32_0 = arith.constant 0 : i32
    %c0_i32_1 = arith.constant 0 : i32
    return %c0_i32, %c0_i32_0 : i32, i32
  }
  func.func @transform_12(%arg0: i32) -> (i32, i32) {
    %c0_i32 = arith.constant 0 : i32
    %c0_i32_0 = arith.constant 0 : i32
    %c0_i32_1 = arith.constant 0 : i32
    return %c0_i32, %c0_i32_0 : i32, i32
  }
  func.func @transform_13(%arg0: i32) -> (i32, i32, i32) {
    %c0_i32 = arith.constant 0 : i32
    %c0_i32_0 = arith.constant 0 : i32
    %c0_i32_1 = arith.constant 0 : i32
    return %arg0, %c0_i32, %c0_i32_0 : i32, i32, i32
  }
}

</mosaic_0001>

<bundles_post_ra>
// kernel: tpu_custom_call.1
= control target key start
LH: loop header
LB: loop body
LE: loop exit
PB: predicated region body
PF: predicated region fallthrough
CT: control target
= control target key end

     0   :  { %s2963_s0 = inlined_call_operand.hbm [shape: f32[2,8,32], index: 0, kind: input, shape index: {}]   ;;  %s2964_s1 = inlined_call_operand.hbm [shape: f32[1,32], index: 1, kind: input, shape index: {}]   ;;  %s2965_s2 = inlined_call_operand.hbm [shape: f32[1,32], index: 2, kind: input, shape index: {}]   ;;  %s2966_s3 = inlined_call_operand.hbm [shape: bf16[32,96], index: 3, kind: input, shape index: {}]   ;;  %s2967_s4 = inlined_call_operand.hbm [shape: f32[1,96], index: 4, kind: input, shape index: {}]   ;;  %s2968_s5 = inlined_call_operand.hbm [shape: bf16[32,32], index: 5, kind: input, shape index: {}]   ;;  %s2969_s6 = inlined_call_operand.hbm [shape: f32[1,32], index: 6, kind: input, shape index: {}]   ;;  %s2970_s7 = inlined_call_operand.hbm [shape: f32[1,32], index: 7, kind: input, shape index: {}]   ;;  %s2971_s8 = inlined_call_operand.hbm [shape: f32[1,32], index: 8, kind: input, shape index: {}]   ;;  %s2972_s9 = inlined_call_operand.hbm [shape: bf16[32,128], index: 9, kind: input, shape index: {}]   ;;  %s2973_s10 = inlined_call_operand.hbm [shape: f32[1,128], index: 10, kind: input, shape index: {}]   ;;  %s2974_s11 = inlined_call_operand.hbm [shape: bf16[128,32], index: 11, kind: input, shape index: {}]   ;;  %s2975_s12 = inlined_call_operand.hbm [shape: f32[1,32], index: 12, kind: input, shape index: {}]   ;;  %s2976_s13 = inlined_call_operand.hbm [shape: f32[2,8,32], index: 13, kind: output, shape index: {}]  }
   0x1   :  { %2986 = sst [smem:[#allocation38_spill]] %s2963_s0 }
   0x2   :  { %2987 = sst [smem:[#allocation39_spill]] %s2964_s1 }
   0x3   :  { %2988 = sst [smem:[#allocation40_spill]] %s2965_s2 }
   0x4   :  { %2989 = sst [smem:[#allocation41_spill]] %s2966_s3 }
   0x5   :  { %2990 = sst [smem:[#allocation42_spill]] %s2976_s13 }
   0x6   :  { %18 = vsyncpa [#allocation7], 0 }
   0x7   :  { %20 = vsyncpa [#allocation7 + $0x1], 0 }
   0x8   :  { %21 = vsyncpa [#allocation10], 0 }
   0x9   :  { %22 = vsyncpa [#allocation13], 0 }
   0xa   :  { %23 = vsyncpa [#allocation16], 0 }
   0xb   :  { %24 = vsyncpa [#allocation19], 0 }
   0xc   :  { %25 = vsyncpa [#allocation22], 0 }
   0xd   :  { %26 = vsyncpa [#allocation25], 0 }
   0xe   :  { %27 = vsyncpa [#allocation8], 0 }
   0xf   :  { %29 = vsyncpa [#allocation8 + $0x1], 0  ;;  %s2418_s25 = smov 0   ;;  %s2420_s26 = smov 0  }
  0x10   :  { %s2422_s27 = smov 0   ;;  %s2424_s28 = smov 0  }
  0x11 LB: > { %s2314_s29 = smov [#allocation9]   ;;  %s2439_s14 = sadd.s32 4294967295, %s2308_s28   ;;  %s2308_s28 = sphi %s2424_s28, %s3030_s28   ;;  %s2304_s27 = sphi %s2422_s27, %s3029_s27   ;;  %s2300_s26 = sphi %s2420_s26, %s3028_s26   ;;  %s2296_s25 = sphi %s2418_s25, %s3027_s25  }
  0x12   : > { %s357_s30 = sshll.u32 %s2314_s29, 4  ;;  %2991 = sst [smem:[#allocation36_spill]] %s2439_s14  ;;  %s2444_s30 = int_to_ptr.vmem [resolvable:$true] %s357_s30 }
  0x13   : > { %p1475_p0 = scmp.ge.s32.totalorder %s2308_s28, 1  ;;  %p2983_p1 = scmp.eq.s32.totalorder %s2439_s14, 0 }
  0x14   : > { %p344_p2 = scmp.lt.s32.totalorder %s2308_s28, 3  ;;  %s2315_s16 = smov [#allocation12]  }
  0x15   : > { %s378_s17 = sshll.u32 %s2315_s16, 4  ;;  %s2316_s19 = smov [#allocation15]   ;;  %s2453_s17 = int_to_ptr.vmem [resolvable:$true] %s378_s17 }
  0x16   : > { %p2446_p3 = pnand %p1475_p0, %p344_p2  ;;  %s402_s20 = sshll.u32 %s2316_s19, 4  ;;  %s2461_s20 = int_to_ptr.vmem [resolvable:$true] %s402_s20 }
  0x17   : > { %s2995_s1 = sld [smem:[#allocation39_spill]] }
  0x18   : > { %s2992_s15 = scalar_select %p2446_p3, 1, 0 }
  0x19   : > { %p1676_p5 = pneg %p2446_p3 }
  0x1a   : > { %2993 = sst [smem:[#allocation37_spill]] %s2992_s15 }
  0x1b   : > { %p2457_p6 = pnand %p1676_p5, %p2983_p1 }
  0x1d   : > { %s1848_s23 = scalar_lea.hbm %s2995_s1, 16  ;;  %p2471_p8 = pneg %p2457_p6 }
  0x1e   : > { %p1849_p7 = scmp.ne.s32.totalorder %s2995_s1, %s1848_s23  ;;  %p1855_p11 = scmp.lt.u32.totalorder %s1848_s23, %s2995_s1 }
  0x20   : > { %p1851_p9 = pnand %p2471_p8, %p1849_p7 }
  0x22   : > { %p1852_p10 = pneg %p1851_p9 }
  0x24   : > { %p1857_p12 = pnand %p1855_p11, %p1852_p10 }
  0x26   : > { %1860 = shalt.err (!%p1857_p12)
}
  0x27   : > { %s1861_s21 = scalar_lea.vmem %s2444_s30, 16  ;;  %s1868_s22 = scalar_lea.vmem %s2444_s30, 32 }
  0x28   : > { %p1862_p13 = scmp.ne.s32.totalorder %s2444_s30, %s1861_s21  ;;  %p1869_p5 = scmp.lt.s32.totalorder %s2444_s30, %s2444_s30 }
  0x29   : > { %p1870_p7 = scmp.lt.s32.totalorder %s1868_s22, %s1861_s21 }
  0x2a   : > { %p1864_p0 = pnand %p1862_p13, %p2471_p8 }
  0x2b   : > { %p1871_p9 = por %p1870_p7, %p1869_p5 }
  0x2c   : > { %p1865_p2 = pneg %p1864_p0 }
  0x2e   : > { %p1872_p4 = pnand %p1871_p9, %p1865_p2 }
  0x30   : > { %1875 = shalt.err (!%p1872_p4)
}
  0x31   : > { %1679 = dma.hbm_to_vmem [thread:$0]  (!%p2457_p6), %s2995_s1, 16, %s2444_s30, [#allocation10]  }
  0x32   : > { %s2997_s3 = sld [smem:[#allocation41_spill]] }
  0x38   : > { %s1876_s19 = scalar_lea.hbm %s2997_s3, 256 }
  0x39   : > { %p1877_p10 = scmp.ne.s32.totalorder %s2997_s3, %s1876_s19  ;;  %p1883_p4 = scmp.lt.u32.totalorder %s1876_s19, %s2997_s3 }
  0x3b   : > { %p1879_p11 = pnand %p1877_p10, %p2471_p8 }
  0x3d   : > { %p1880_p12 = pneg %p1879_p11 }
  0x3f   : > { %p1885_p13 = pnand %p1883_p4, %p1880_p12 }
  0x41   : > { %1888 = shalt.err (!%p1885_p13)
}
  0x42   : > { %s1889_s30 = scalar_lea.vmem %s2453_s17, 256  ;;  %p1897_p7 = scmp.lt.s32.totalorder %s2453_s17, %s2453_s17 }
  0x43   : > { %p1890_p0 = scmp.ne.s32.totalorder %s2453_s17, %s1889_s30  ;;  %p1898_p9 = scmp.lt.s32.totalorder %s1889_s30, %s1889_s30 }
  0x45   : > { %p1892_p2 = pnand %p1890_p0, %p2471_p8  ;;  %p1899_p10 = por %p1898_p9, %p1897_p7 }
  0x47   : > { %p1893_p5 = pneg %p1892_p2 }
  0x49   : > { %p1900_p11 = pnand %p1899_p10, %p1893_p5 }
  0x4b   : > { %1903 = shalt.err (!%p1900_p11)
}
  0x4c   : > { %s2317_s0 = smov 64   ;;  %s2318_s15 = smov 4  }
  0x4d   : > { %1685 = dma.hbm_to_vmem [thread:$0]  (!%p2457_p6), %s2997_s3, 256, %s2453_s17, [#allocation13], %s2317_s0, %s2317_s0, %s2318_s15  }
  0x4e   : > { %s1904_s19 = scalar_lea.hbm %s2968_s5, 256 }
  0x4f   : > { %p1905_p12 = scmp.ne.s32.totalorder %s2968_s5, %s1904_s19  ;;  %p1911_p0 = scmp.lt.u32.totalorder %s1904_s19, %s2968_s5 }
  0x51   : > { %p1907_p4 = pnand %p1905_p12, %p2471_p8 }
  0x53   : > { %p1908_p13 = pneg %p1907_p4 }
  0x55   : > { %p1913_p2 = pnand %p1911_p0, %p1908_p13 }
  0x57   : > { %1916 = shalt.err (!%p1913_p2)
}
  0x58   : > { %s1917_s17 = scalar_lea.vmem %s2461_s20, 256  ;;  %p1925_p10 = scmp.lt.s32.totalorder %s2461_s20, %s2461_s20 }
  0x59   : > { %p1918_p5 = scmp.ne.s32.totalorder %s2461_s20, %s1917_s17  ;;  %p1926_p11 = scmp.lt.s32.totalorder %s1917_s17, %s1917_s17 }
  0x5b   : > { %p1920_p7 = pnand %p1918_p5, %p2471_p8  ;;  %p1927_p12 = por %p1926_p11, %p1925_p10 }
  0x5d   : > { %p1921_p9 = pneg %p1920_p7 }
  0x5f   : > { %p1928_p4 = pnand %p1927_p12, %p1921_p9 }
  0x61   : > { %1931 = shalt.err (!%p1928_p4)
}
  0x62   : > { %1691 = dma.hbm_to_vmem [thread:$0]  (!%p2457_p6), %s2968_s5, 256, %s2461_s20, [#allocation16], %s2317_s0, %s2317_s0, %s2318_s15  }
  0x63   : > { %s2319_s23 = smov [#allocation18]   ;;  %s2320_s29 = smov [#allocation21]  }
  0x64   : > { %s427_s24 = sshll.u32 %s2319_s23, 4  ;;  %s448_s19 = sshll.u32 %s2320_s29, 4  ;;  %s428_s24 = int_to_ptr.vmem [resolvable:$true] %s427_s24  ;;  %s449_s19 = int_to_ptr.vmem [resolvable:$true] %s448_s19 }
  0x65   : > { %s1932_s30 = scalar_lea.hbm %s2970_s7, 16 }
  0x66   : > { %p1933_p13 = scmp.ne.s32.totalorder %s2970_s7, %s1932_s30  ;;  %p1939_p5 = scmp.lt.u32.totalorder %s1932_s30, %s2970_s7 }
  0x68   : > { %p1935_p0 = pnand %p1933_p13, %p2471_p8 }
  0x6a   : > { %p1936_p2 = pneg %p1935_p0 }
  0x6c   : > { %p1941_p7 = pnand %p1939_p5, %p1936_p2 }
  0x6e   : > { %1944 = shalt.err (!%p1941_p7)
}
  0x6f   : > { %s1945_s20 = scalar_lea.vmem %s428_s24, 16  ;;  %s1952_s13 = scalar_lea.vmem %s428_s24, 32 }
  0x70   : > { %p1946_p9 = scmp.ne.s32.totalorder %s428_s24, %s1945_s20  ;;  %p1953_p12 = scmp.lt.s32.totalorder %s428_s24, %s428_s24 }
  0x71   : > { %p1954_p4 = scmp.lt.s32.totalorder %s1952_s13, %s1945_s20 }
  0x72   : > { %p1948_p10 = pnand %p1946_p9, %p2471_p8 }
  0x73   : > { %p1955_p1 = por %p1954_p4, %p1953_p12 }
  0x74   : > { %p1949_p11 = pneg %p1948_p10 }
  0x76   : > { %p1956_p3 = pnand %p1955_p1, %p1949_p11 }
  0x78   : > { %1959 = shalt.err (!%p1956_p3)
}
  0x79   : > { %1697 = dma.hbm_to_vmem [thread:$0]  (!%p2457_p6), %s2970_s7, 16, %s428_s24, [#allocation19]  }
  0x7a   : > { %s1960_s21 = scalar_lea.hbm %s2972_s9, 256 }
  0x7b   : > { %p1961_p13 = scmp.ne.s32.totalorder %s2972_s9, %s1960_s21  ;;  %p1967_p3 = scmp.lt.u32.totalorder %s1960_s21, %s2972_s9 }
  0x7d   : > { %p1963_p0 = pnand %p1961_p13, %p2471_p8 }
  0x7f   : > { %p1964_p1 = pneg %p1963_p0 }
  0x81   : > { %p1969_p2 = pnand %p1967_p3, %p1964_p1 }
  0x83   : > { %1972 = shalt.err (!%p1969_p2)
}
  0x84   : > { %s1973_s20 = scalar_lea.vmem %s449_s19, 256  ;;  %p1981_p10 = scmp.lt.s32.totalorder %s449_s19, %s449_s19 }
  0x85   : > { %p1974_p5 = scmp.ne.s32.totalorder %s449_s19, %s1973_s20  ;;  %p1982_p11 = scmp.lt.s32.totalorder %s1973_s20, %s1973_s20 }
  0x87   : > { %p1976_p7 = pnand %p1974_p5, %p2471_p8  ;;  %p1983_p12 = por %p1982_p11, %p1981_p10 }
  0x89   : > { %p1977_p9 = pneg %p1976_p7 }
  0x8b   : > { %p1984_p4 = pnand %p1983_p12, %p1977_p9 }
  0x8d   : > { %1987 = shalt.err (!%p1984_p4)
}
  0x8e   : > { %1703 = dma.hbm_to_vmem [thread:$0]  (!%p2457_p6), %s2972_s9, 256, %s449_s19, [#allocation22], %s2317_s0, %s2317_s0, %s2318_s15  }
  0x8f   : > { %s2321_s3 = smov [#allocation24]   ;;  %s2322_s14 = smov [#allocation11]  }
  0x90   : > { %s472_s23 = sshll.u32 %s2321_s3, 4  ;;  %s368_s29 = sshll.u32 %s2322_s14, 4  ;;  %s473_s23 = int_to_ptr.vmem [resolvable:$true] %s472_s23  ;;  %s369_s29 = int_to_ptr.vmem [resolvable:$true] %s368_s29 }
  0x91   : > { %s1988_s30 = scalar_lea.hbm %s2974_s11, 1024 }
  0x92   : > { %p1989_p13 = scmp.ne.s32.totalorder %s2974_s11, %s1988_s30  ;;  %p1995_p3 = scmp.lt.u32.totalorder %s1988_s30, %s2974_s11 }
  0x94   : > { %p1991_p0 = pnand %p1989_p13, %p2471_p8 }
  0x96   : > { %p1992_p1 = pneg %p1991_p0 }
  0x98   : > { %p1997_p2 = pnand %p1995_p3, %p1992_p1 }
  0x9a   : > { %2000 = shalt.err (!%p1997_p2)
}
  0x9b   : > { %s2001_s19 = scalar_lea.vmem %s473_s23, 1024  ;;  %p2009_p10 = scmp.lt.s32.totalorder %s473_s23, %s473_s23 }
  0x9c   : > { %p2002_p5 = scmp.ne.s32.totalorder %s473_s23, %s2001_s19  ;;  %p2010_p11 = scmp.lt.s32.totalorder %s2001_s19, %s2001_s19 }
  0x9e   : > { %p2004_p7 = pnand %p2002_p5, %p2471_p8  ;;  %p2011_p12 = por %p2010_p11, %p2009_p10 }
  0xa0   : > { %p2005_p9 = pneg %p2004_p7 }
  0xa2   : > { %p2012_p4 = pnand %p2011_p12, %p2005_p9 }
  0xa4   : > { %2015 = shalt.err (!%p2012_p4)
}
  0xa5   : > { %1709 = dma.hbm_to_vmem [thread:$0]  (!%p2457_p6), %s2974_s11, 1024, %s473_s23, [#allocation25], %s2317_s0, %s2317_s0, %s2318_s15  }
  0xa6   : > { %s2998_s2 = sld [smem:[#allocation40_spill]] }
  0xac   : > { %s2016_s22 = scalar_lea.hbm %s2998_s2, 16 }
  0xad   : > { %p2017_p13 = scmp.ne.s32.totalorder %s2998_s2, %s2016_s22  ;;  %p2023_p3 = scmp.lt.u32.totalorder %s2016_s22, %s2998_s2 }
  0xaf   : > { %p2019_p0 = pnand %p2017_p13, %p2471_p8 }
  0xb1   : > { %p2020_p1 = pneg %p2019_p0 }
  0xb3   : > { %p2025_p2 = pnand %p2023_p3, %p2020_p1 }
  0xb5   : > { %2028 = shalt.err (!%p2025_p2)
}
  0xb6   : > { %s2029_s24 = scalar_lea.vmem %s369_s29, 16  ;;  %s2036_s0 = scalar_lea.vmem %s369_s29, 32 }
  0xb7   : > { %p2030_p5 = scmp.ne.s32.totalorder %s369_s29, %s2029_s24  ;;  %p2037_p10 = scmp.lt.s32.totalorder %s369_s29, %s369_s29 }
  0xb8   : > { %p2038_p11 = scmp.lt.s32.totalorder %s2036_s0, %s2029_s24 }
  0xb9   : > { %p2032_p7 = pnand %p2030_p5, %p2471_p8 }
  0xba   : > { %p2039_p12 = por %p2038_p11, %p2037_p10 }
  0xbb   : > { %p2033_p9 = pneg %p2032_p7 }
  0xbd   : > { %p2040_p4 = pnand %p2039_p12, %p2033_p9 }
  0xbf   : > { %2043 = shalt.err (!%p2040_p4)
}
  0xc0   : > { %1682 = dma.hbm_to_vmem [thread:$0]  (!%p2457_p6), %s2998_s2, 16, %s369_s29, [#allocation10]  }
  0xc1   : > { %s2323_s19 = smov [#allocation14]   ;;  %s2324_s3 = smov [#allocation17]  }
  0xc2   : > { %s392_s13 = sshll.u32 %s2323_s19, 4  ;;  %s416_s14 = sshll.u32 %s2324_s3, 4  ;;  %s393_s13 = int_to_ptr.vmem [resolvable:$true] %s392_s13  ;;  %s417_s14 = int_to_ptr.vmem [resolvable:$true] %s416_s14 }
  0xc3   : > { %s2044_s30 = scalar_lea.hbm %s2967_s4, 16 }
  0xc4   : > { %p2045_p13 = scmp.ne.s32.totalorder %s2967_s4, %s2044_s30  ;;  %p2051_p3 = scmp.lt.u32.totalorder %s2044_s30, %s2967_s4 }
  0xc6   : > { %p2047_p0 = pnand %p2045_p13, %p2471_p8 }
  0xc8   : > { %p2048_p1 = pneg %p2047_p0 }
  0xca   : > { %p2053_p2 = pnand %p2051_p3, %p2048_p1 }
  0xcc   : > { %2056 = shalt.err (!%p2053_p2)
}
  0xcd   : > { %s2057_s29 = scalar_lea.vmem %s393_s13, 16  ;;  %s2064_s0 = scalar_lea.vmem %s393_s13, 32 }
  0xce   : > { %p2058_p5 = scmp.ne.s32.totalorder %s393_s13, %s2057_s29  ;;  %p2065_p10 = scmp.lt.s32.totalorder %s393_s13, %s393_s13 }
  0xcf   : > { %p2066_p11 = scmp.lt.s32.totalorder %s2064_s0, %s2057_s29 }
  0xd0   : > { %p2060_p7 = pnand %p2058_p5, %p2471_p8 }
  0xd1   : > { %p2067_p12 = por %p2066_p11, %p2065_p10 }
  0xd2   : > { %p2061_p9 = pneg %p2060_p7 }
  0xd4   : > { %p2068_p4 = pnand %p2067_p12, %p2061_p9 }
  0xd6   : > { %2071 = shalt.err (!%p2068_p4)
}
  0xd7   : > { %1688 = dma.hbm_to_vmem [thread:$0]  (!%p2457_p6), %s2967_s4, 16, %s393_s13, [#allocation13]  }
  0xd8   : > { %s2072_s21 = scalar_lea.hbm %s2969_s6, 16 }
  0xd9   : > { %p2073_p13 = scmp.ne.s32.totalorder %s2969_s6, %s2072_s21  ;;  %p2079_p3 = scmp.lt.u32.totalorder %s2072_s21, %s2969_s6 }
  0xdb   : > { %p2075_p0 = pnand %p2073_p13, %p2471_p8 }
  0xdd   : > { %p2076_p1 = pneg %p2075_p0 }
  0xdf   : > { %p2081_p2 = pnand %p2079_p3, %p2076_p1 }
  0xe1   : > { %2084 = shalt.err (!%p2081_p2)
}
  0xe2   : > { %s2085_s20 = scalar_lea.vmem %s417_s14, 16  ;;  %s2092_s13 = scalar_lea.vmem %s417_s14, 32 }
  0xe3   : > { %p2086_p5 = scmp.ne.s32.totalorder %s417_s14, %s2085_s20  ;;  %p2093_p10 = scmp.lt.s32.totalorder %s417_s14, %s417_s14 }
  0xe4   : > { %p2094_p11 = scmp.lt.s32.totalorder %s2092_s13, %s2085_s20 }
  0xe5   : > { %p2088_p7 = pnand %p2086_p5, %p2471_p8 }
  0xe6   : > { %p2095_p12 = por %p2094_p11, %p2093_p10 }
  0xe7   : > { %p2089_p9 = pneg %p2088_p7 }
  0xe9   : > { %p2096_p4 = pnand %p2095_p12, %p2089_p9 }
  0xeb   : > { %2099 = shalt.err (!%p2096_p4)
}
  0xec   : > { %1694 = dma.hbm_to_vmem [thread:$0]  (!%p2457_p6), %s2969_s6, 16, %s417_s14, [#allocation16]  }
  0xed   : > { %s2325_s0 = smov [#allocation20]   ;;  %s2326_s23 = smov [#allocation23]  }
  0xee   : > { %s438_s15 = sshll.u32 %s2325_s0, 4  ;;  %s462_s19 = sshll.u32 %s2326_s23, 4  ;;  %s439_s15 = int_to_ptr.vmem [resolvable:$true] %s438_s15  ;;  %s463_s19 = int_to_ptr.vmem [resolvable:$true] %s462_s19 }
  0xef   : > { %s2100_s22 = scalar_lea.hbm %s2971_s8, 16 }
  0xf0   : > { %p2101_p13 = scmp.ne.s32.totalorder %s2971_s8, %s2100_s22  ;;  %p2107_p3 = scmp.lt.u32.totalorder %s2100_s22, %s2971_s8 }
  0xf2   : > { %p2103_p0 = pnand %p2101_p13, %p2471_p8 }
  0xf4   : > { %p2104_p1 = pneg %p2103_p0 }
  0xf6   : > { %p2109_p2 = pnand %p2107_p3, %p2104_p1 }
  0xf8   : > { %2112 = shalt.err (!%p2109_p2)
}
  0xf9   : > { %s2113_s14 = scalar_lea.vmem %s439_s15, 16  ;;  %s2120_s13 = scalar_lea.vmem %s439_s15, 32 }
  0xfa   : > { %p2114_p5 = scmp.ne.s32.totalorder %s439_s15, %s2113_s14  ;;  %p2121_p10 = scmp.lt.s32.totalorder %s439_s15, %s439_s15 }
  0xfb   : > { %p2122_p11 = scmp.lt.s32.totalorder %s2120_s13, %s2113_s14 }
  0xfc   : > { %p2116_p7 = pnand %p2114_p5, %p2471_p8 }
  0xfd   : > { %p2123_p12 = por %p2122_p11, %p2121_p10 }
  0xfe   : > { %p2117_p9 = pneg %p2116_p7 }
 0x100   : > { %p2124_p4 = pnand %p2123_p12, %p2117_p9 }
 0x102   : > { %2127 = shalt.err (!%p2124_p4)
}
 0x103   : > { %1700 = dma.hbm_to_vmem [thread:$0]  (!%p2457_p6), %s2971_s8, 16, %s439_s15, [#allocation19]  }
 0x104   : > { %s2128_s3 = scalar_lea.hbm %s2973_s10, 16 }
 0x105   : > { %p2129_p13 = scmp.ne.s32.totalorder %s2973_s10, %s2128_s3  ;;  %p2135_p3 = scmp.lt.u32.totalorder %s2128_s3, %s2973_s10 }
 0x107   : > { %p2131_p0 = pnand %p2129_p13, %p2471_p8 }
 0x109   : > { %p2132_p1 = pneg %p2131_p0 }
 0x10b   : > { %p2137_p2 = pnand %p2135_p3, %p2132_p1 }
 0x10d   : > { %2140 = shalt.err (!%p2137_p2)
}
 0x10e   : > { %s2141_s1 = scalar_lea.vmem %s463_s19, 16  ;;  %s2148_s15 = scalar_lea.vmem %s463_s19, 32 }
 0x10f   : > { %p2142_p5 = scmp.ne.s32.totalorder %s463_s19, %s2141_s1  ;;  %p2149_p10 = scmp.lt.s32.totalorder %s463_s19, %s463_s19 }
 0x110   : > { %p2150_p11 = scmp.lt.s32.totalorder %s2148_s15, %s2141_s1 }
 0x111   : > { %p2144_p7 = pnand %p2142_p5, %p2471_p8 }
 0x112   : > { %p2151_p12 = por %p2150_p11, %p2149_p10 }
 0x113   : > { %p2145_p9 = pneg %p2144_p7 }
 0x115   : > { %p2152_p4 = pnand %p2151_p12, %p2145_p9 }
 0x117   : > { %2155 = shalt.err (!%p2152_p4)
}
 0x118   : > { %1706 = dma.hbm_to_vmem [thread:$0]  (!%p2457_p6), %s2973_s10, 16, %s463_s19, [#allocation22]  }
 0x119   : > { %s2327_s13 = smov [#allocation26]   ;;  %s2156_s23 = scalar_lea.hbm %s2975_s12, 16 }
 0x11a   : > { %s486_s24 = sshll.u32 %s2327_s13, 4  ;;  %p2157_p13 = scmp.ne.s32.totalorder %s2975_s12, %s2156_s23  ;;  %s487_s24 = int_to_ptr.vmem [resolvable:$true] %s486_s24 }
 0x11b   : > { %p2163_p3 = scmp.lt.u32.totalorder %s2156_s23, %s2975_s12 }
 0x11c   : > { %p2159_p0 = pnand %p2157_p13, %p2471_p8 }
 0x11e   : > { %p2160_p1 = pneg %p2159_p0 }
 0x120   : > { %p2165_p2 = pnand %p2163_p3, %p2160_p1 }
 0x122   : > { %2168 = shalt.err (!%p2165_p2)
}
 0x123   : > { %s2169_s19 = scalar_lea.vmem %s487_s24, 16  ;;  %s2176_s17 = scalar_lea.vmem %s487_s24, 32 }
 0x124   : > { %p2170_p5 = scmp.ne.s32.totalorder %s487_s24, %s2169_s19  ;;  %p2177_p10 = scmp.lt.s32.totalorder %s487_s24, %s487_s24 }
 0x125   : > { %p2178_p11 = scmp.lt.s32.totalorder %s2176_s17, %s2169_s19 }
 0x126   : > { %p2172_p7 = pnand %p2170_p5, %p2471_p8 }
 0x127   : > { %p2179_p12 = por %p2178_p11, %p2177_p10 }
 0x128   : > { %p2173_p9 = pneg %p2172_p7 }
 0x12a   : > { %p2180_p4 = pnand %p2179_p12, %p2173_p9 }
 0x12c   : > { %2183 = shalt.err (!%p2180_p4)
}
 0x12d   : > { %s2999_s16 = sld [smem:[#allocation36_spill]]  ;;  %s1474_s20 = sadd.s32 4294967294, %s2308_s28  }
 0x12e   : > { %1712 = dma.hbm_to_vmem [thread:$0]  (!%p2457_p6), %s2975_s12, 16, %s487_s24, [#allocation25]  }
 0x12f   : > { %s2715_s18 = sadd.s32 1, %s2308_s28   ;;  %s42_s13 = sadd.s32 1, %s2304_s27 }
 0x130   : > { %s39_s14 = ssub.s32 %s2308_s28, %s2715_s18  ;;  %p49_p13 = scmp.ne.s32.totalorder %s2304_s27, %s2300_s26 }
 0x131   : > { %p40_p8 = scmp.eq.s32.totalorder %s39_s14, 0  ;;  %p50_p0 = scmp.eq.s32.totalorder %s2308_s28, 0 }
 0x132   : > { %p55_p1 = scmp.ne.s32.totalorder %s2300_s26, %s2296_s25  ;;  %p337_p7 = scmp.eq.s32.totalorder %s1474_s20, 1 }
 0x133   : > { %s2726_s29 = scalar_select %p40_p8, %s2304_s27, %s42_s13  }
 0x134   : > { %p2728_p3 = por %p50_p0, %p49_p13  ;;  %p3001_p2 = scmp.eq.s32.totalorder %s2999_s16, 0 }
 0x135   : > { %p331_p5 = scmp.eq.s32.totalorder %s2999_s16, 1  ;;  %p1733_p9 = scmp.lt.s32.totalorder %s2308_s28, 2 }
 0x136   : > { %p2734_p6 = por %p3001_p2, %p55_p1  ;;  %s497_s23 = sand.u32 1, %s2304_s27  }
 0x137   : > { %p2741_p10 = por %p331_p5, %p49_p13  ;;  %p2745_p11 = por %p337_p7, %p55_p1 }
 0x138   : > { %s1489_s22 = sshll.u32 %s497_s23, 3  ;;  %s1490_s30 = sshll.u32 %s2308_s28, 7 }
 0x139   : > { %s3003_s3 = scalar_select %p2741_p10, 1, 0 }
 0x13a   : > { %s3004_s21 = scalar_select %p2745_p11, 1, 0 }
 0x13b   : > { %s3005_s1 = sld [smem:[#allocation38_spill]]  ;;  %s501_s16 = scalar_lea.vmem [#allocation6], %s1489_s22 }
 0x13c   : > { %s508_s20 = sshll.u32 %s501_s16, 4  ;;  %p2759_p12 = pnand %p1733_p9, %p2728_p3  ;;  %s2755_s20 = int_to_ptr.vmem [resolvable:$true] %s508_s20 }
 0x13d   : > { %s498_s13 = scalar_lea.sflag [#allocation7], %s497_s23 }
 0x13e   : > { %p2186_p8 = pneg %p2759_p12 }
 0x141   : > { %s2753_s15 = scalar_lea.hbm %s3005_s1, %s1490_s30  ;;  %s2189_s19 = scalar_lea.hbm %s3005_s1, 256 }
 0x142   : > { %s2184_s2 = scalar_lea.hbm %s2753_s15, 128  ;;  %p2190_p1 = scmp.lt.u32.totalorder %s2753_s15, %s3005_s1 }
 0x143   : > { %p2185_p4 = scmp.ne.s32.totalorder %s2753_s15, %s2184_s2  ;;  %p2191_p3 = scmp.lt.u32.totalorder %s2189_s19, %s2184_s2 }
 0x144   : > { %p2193_p5 = scmp.lt.u32.totalorder %s2184_s2, %s2753_s15 }
 0x145   : > { %p2187_p13 = pnand %p2186_p8, %p2185_p4  ;;  %p2192_p2 = por %p2191_p3, %p2190_p1 }
 0x147   : > { %p2188_p0 = pneg %p2187_p13  ;;  %p2194_p7 = por %p2193_p5, %p2192_p2 }
 0x149   : > { %p2195_p9 = pnand %p2194_p7, %p2188_p0 }
 0x14b   : > { %2198 = shalt.err (!%p2195_p9)
}
 0x14c   : > { %s2199_s23 = scalar_lea.vmem %s2755_s20, 128  ;;  %s2328_s16 = smov [#allocation6]  }
 0x14d   : > { %p2200_p4 = scmp.ne.s32.totalorder %s2755_s20, %s2199_s23  ;;  %s2204_s22 = sshll.u32 %s2328_s16, 4  ;;  %s2205_s22 = int_to_ptr.vmem [resolvable:$false] %s2204_s22 }
 0x14e   : > { %s2206_s30 = scalar_lea.vmem %s2205_s22, 256  ;;  %p2207_p10 = scmp.lt.s32.totalorder %s2755_s20, %s2205_s22 }
 0x14f   : > { %p2202_p13 = pnand %p2200_p4, %p2186_p8  ;;  %p2208_p1 = scmp.lt.s32.totalorder %s2206_s30, %s2199_s23 }
 0x151   : > { %p2203_p11 = pneg %p2202_p13  ;;  %p2209_p3 = por %p2208_p1, %p2207_p10 }
 0x153   : > { %p2210_p2 = pnand %p2209_p3, %p2203_p11 }
 0x155   : > { %2213 = shalt.err (!%p2210_p2)
}
 0x156   : > { %1716 = dma.hbm_to_vmem [thread:$0]  (!%p2759_p12), %s2753_s15, 128, %s2755_s20, %s498_s13  }
 0x157   : > { %s3007_s2 = sld [smem:[#allocation37_spill]] }
 0x15d   : > { %p3008_p0 = scmp.ne.s32.totalorder %s3007_s2, 0 }
 0x15e   : > { %s2791_s19 = sand.u32 (!%p3008_p0), 1, %s2300_s26  }
 0x15f   : > { %517 = sbr.rel (%p3008_p0) target bundleno = 2515 (0x9d3), region = 72  ;;  %s1492_s0 = sshll.u32 (!%p3008_p0), %s2791_s19, 3 }
 0x160   : > { %s520_s17 = scalar_lea.sflag (!%p3008_p0), [#allocation7], %s2791_s19  ;;  %s2797_s23 = scalar_lea.vmem (!%p3008_p0), [#allocation6], %s1492_s0 }
 0x166   : > { %2263 = dma.done.wait (%p2734_p6), %s520_s17, 128  }
 0x167   : > { %2265 = vsyncadd (%p2734_p6), %s520_s17, 4294967168  ;;  %s3009_s15 = sld [smem:[#allocation36_spill]] }
 0x16d   : > { %p3010_p10 = scmp.eq.s32.totalorder %s3009_s15, 0 }
 0x16f   : > { %2267 = dma.done.wait (%p3010_p10), [#allocation10], 32   ;;  %p3011_p11 = pmov %p3010_p10 }
 0x170   : > { %p3012_p12 = pmov %p3010_p10 }
 0x171   : > { %2269 = vsyncadd (%p3011_p11), [#allocation10], 4294967264 }
 0x172   : > { %2271 = dma.done.wait (%p3012_p12), [#allocation13], 272   ;;  %p3013_p8 = pmov %p3010_p10 }
 0x174   : > { %2273 = vsyncadd (%p3013_p8), [#allocation13], 4294967024  ;;  %p3014_p5 = pmov %p3013_p8 }
 0x176   : > { %2275 = dma.done.wait (%p3014_p5), [#allocation16], 272   ;;  %p3015_p7 = pmov %p3014_p5 }
 0x177   : > { %p3016_p6 = pmov %p3014_p5 }
 0x178   : > { %2277 = vsyncadd (%p3015_p7), [#allocation16], 4294967024 }
 0x179   : > { %2279 = dma.done.wait (%p3016_p6), [#allocation19], 32   ;;  %p3017_p9 = pmov %p3014_p5 }
 0x17a   : > { %p3018_p4 = pmov %p3014_p5 }
 0x17b   : > { %2281 = vsyncadd (%p3017_p9), [#allocation19], 4294967264 }
 0x17c   : > { %2283 = dma.done.wait (%p3018_p4), [#allocation22], 272   ;;  %p3019_p13 = pmov %p3018_p4 }
 0x17d   : > { %p3020_p1 = pmov %p3018_p4 }
 0x17e   : > { %2285 = vsyncadd (%p3019_p13), [#allocation22], 4294967024 }
 0x17f   : > { %2287 = dma.done.wait (%p3020_p1), [#allocation25], 1040   ;;  %p3021_p3 = pmov %p3020_p1 }
 0x180   : > { %vm624_vm0 = vcmask 261120   ;;  %v623_v0 = vld [vmem:[%s2797_s23] sm:$0xff]  ;;  %v618_v4 = vlaneseq  ;;  %v1819_v5 = vld [vmem:[#allocation12] sm:$0xff]   ;;  %v2329_v6 = vmov 0.0   ;;  %vm2330_vm1 = vmmov 0   ;;  %s2331_s24 = smov 120  }
 0x181   : > { %2289 = vsyncadd (%p3021_p3), [#allocation25], 4294966256  ;;  %v625_v1 = vsel %vm624_vm0, %v623_v0, 0.0  ;;  %v630_v2 = vmul.f32 %v623_v0, %v623_v0  ;;  %1568 = vmatprep.subr.bf16.mxu0 %v2329_v6  ;;  %1572 = vmatprep.mubr.msk.bf16.mxu0 %vm2330_vm1, %v2329_v6  ;;  %v1820_v9 = vld [vmem:[#allocation12 + $0x8] sm:$0xff]   ;;  %v1506_v20 = vld [vmem:[#allocation9] ss:$0 sm:$0xff] }
 0x182   : > { %626 = vadd.xlane.f32.xlu0 %v625_v1  ;;  %v2833_v7 = vshrl.u32 %v618_v4, 7  ;;  %v2835_v8 = vand.u32 127, %v618_v4  ;;  %1569 = vmatpush3.bf16.msra.mxu0 %v1819_v5  ;;  %v1507_v22 = vld [vmem:[#allocation11] ss:$0 sm:$0xff]  ;;  %v1508_v26 = vld [vmem:[#allocation14] ss:$0 sm:$0xff] }
 0x183   : > { %v631_v3 = vsel %vm624_vm0, %v630_v2, 0.0  ;;  %1570 = vmatprep.subr.bf16.mxu0 %v2329_v6  ;;  %vm723_vm3 = vcmask 60416   ;;  %s2332_s20 = smov 96   ;;  %s2333_s14 = smov 72  }
 0x184   : > { %vm622_vm2 = vcmp.ge.s32.totalorder %v2833_v7, %v2835_v8  ;;  %s2334_s13 = smov 64   ;;  %s2335_s16 = smov 88  }
 0x185   : > { %s2336_s22 = smov 56   ;;  %s2337_s30 = smov 112  }
 0x186   : > { %632 = vadd.xlane.f32.xlu0 %v631_v3  ;;  %1571 = vmatpush3.bf16.msra.mxu0 %v1820_v9  ;;  %s2338_s2 = smov 80   ;;  %s2339_s17 = smov 48  }
 0x187   : > { %s2340_s15 = smov 104  }
 0x20f   : > { %v627_v10 = vpop.xlane.xlu0 %626 }
 0x210   : > { %v629_v11 = vmul.f32 0.03125, %v627_v10 }
 0x212   : > { %v635_v13 = vmul.f32 %v629_v11, %v629_v11  ;;  %v638_v18 = vsub.f32 %v623_v0, %v629_v11 }
 0x213   : > { %v633_v12 = vpop.xlane.xlu0 %632 }
 0x214   : > { %v634_v14 = vmul.f32 0.03125, %v633_v12 }
 0x216   : > { %v636_v15 = vsub.f32 %v634_v14, %v635_v13 }
 0x218   : > { %v637_v16 = vmax.f32 %v636_v15, 0.0 }
 0x21a   : > { %v639_v17 = vadd.f32 1e-05, %v637_v16 }
 0x21c   : > { %1821 = vrsqrt.f32 %v639_v17 }
 0x226   : > { %v1822_v19 = vpop.eup %1821 }
 0x227   : > { %v641_v21 = vmul.f32 %v1822_v19, %v638_v18 }
 0x229   : > { %v648_v23 = vmul.f32 %v1506_v20, %v641_v21 }
 0x22b   : > { %v655_v24 = vadd.f32 %v1507_v22, %v648_v23 }
 0x22d   : > { %v656_v25 = vpack.c.bf16 %v655_v24, %v655_v24 }
 0x22f   : > { %1573 = vmatmul.mubr.msk.bf16.vlgmr.msra.gmra.mrb[0].mxu0 %vm624_vm0, %v656_v25 }
 0x302   : > { %v716_v27 = vpop.f32.mrb[0].mxu0 }
 0x303   : > { %v717_v28 = vadd.f32 %v1508_v26, %v716_v27  ;;  %v1574_v29 = vpop.f32.mrb[1].mxu0 }
 0x304   : > { %v719_v30 = vpop.f32.mrb[2].mxu0 }
 0x305   : > { %v722_v31 = vpack.c.bf16 %v717_v28, %v717_v28  ;;  %v1575_v32 = vpop.f32.mrb[3].mxu0 }
 0x307   : > { %736 = vrot.lane.b32.xlu0 %v722_v31, %s2331_s24  ;;  %728 = vrot.lane.b32.xlu1 %v722_v31, %s2332_s20  ;;  %724 = vst.msk [vmem:[#allocation2] sm:$0xf] %vm723_vm3, %v722_v31  ;;  %s2341_s24 = smov 40   ;;  %s2855_s20 = scalar_lea.vmem [#allocation27], %s1492_s0 }
 0x30b   : > { %781 = vrot.lane.b32.xlu0 %v722_v31, %s2333_s14  ;;  %732 = vrot.lane.b32.xlu1 %v722_v31, %s2334_s13  ;;  %s2857_s14 = smov 0  }
 0x30f   : > { %743 = vrot.lane.b32.xlu1 %v722_v31, %s2335_s16 }
 0x313   : > { %749 = vrot.lane.b32.xlu1 %v722_v31, %s2336_s22 }
 0x317   : > { %755 = vrot.lane.b32.xlu1 %v722_v31, %s2337_s30 }
 0x31b   : > { %762 = vrot.lane.b32.xlu1 %v722_v31, %s2338_s2 }
 0x31f   : > { %768 = vrot.lane.b32.xlu1 %v722_v31, %s2339_s17 }
 0x323   : > { %774 = vrot.lane.b32.xlu1 %v722_v31, %s2340_s15 }
 0x327   : > { %787 = vrot.lane.b32.xlu1 %v722_v31, %s2341_s24 }
 0x379   : > { %v737_v33 = vpop.permute.xlu0 %736  ;;  %v729_v34 = vpop.permute.xlu1 %728 }
 0x37a   : > { %742 = vst.msk [vmem:[#allocation2 + $0x4] sm:$0xf] %vm723_vm3, %v737_v33  ;;  %731 = vst.msk [vmem:[#allocation3] sm:$0xf] %vm723_vm3, %v729_v34 }
 0x37d   : > { %v782_v35 = vpop.permute.xlu0 %781  ;;  %v733_v36 = vpop.permute.xlu1 %732 }
 0x37e   : > { %786 = vst.msk [vmem:[#allocation3 + $0xc] sm:$0xf] %vm723_vm3, %v782_v35  ;;  %735 = vst.msk [vmem:[#allocation4] sm:$0xf] %vm723_vm3, %v733_v36 }
 0x381   : > { %v744_v37 = vpop.permute.xlu1 %743 }
 0x382   : > { %748 = vst.msk [vmem:[#allocation3 + $0x4] sm:$0xf] %vm723_vm3, %v744_v37 }
 0x385   : > { %v750_v38 = vpop.permute.xlu1 %749 }
 0x386   : > { %754 = vst.msk [vmem:[#allocation4 + $0x4] sm:$0xf] %vm723_vm3, %v750_v38 }
 0x389   : > { %v756_v39 = vpop.permute.xlu1 %755 }
 0x38a   : > { %761 = vst.msk [vmem:[#allocation2 + $0x8] sm:$0xf] %vm723_vm3, %v756_v39 }
 0x38d   : > { %v763_v40 = vpop.permute.xlu1 %762 }
 0x38e   : > { %767 = vst.msk [vmem:[#allocation3 + $0x8] sm:$0xf] %vm723_vm3, %v763_v40 }
 0x391   : > { %v769_v41 = vpop.permute.xlu1 %768 }
 0x392   : > { %773 = vst.msk [vmem:[#allocation4 + $0x8] sm:$0xf] %vm723_vm3, %v769_v41 }
 0x395   : > { %v775_v42 = vpop.permute.xlu1 %774 }
 0x396   : > { %780 = vst.msk [vmem:[#allocation2 + $0xc] sm:$0xf] %vm723_vm3, %v775_v42 }
 0x399   : > { %v788_v43 = vpop.permute.xlu1 %787 }
 0x39a   : > { %792 = vst.msk [vmem:[#allocation4 + $0xc] sm:$0xf] %vm723_vm3, %v788_v43 }
 0x39b LB: >> { %v2342_v44 = vmov 0.0   ;;  %vm2343_vm4 = vmmov 0   ;;  %s2863_s13 = sshll.u32 %s2312_s14, 2  ;;  %vm809_vm5 = vcmask 64512   ;;  %vm876_vm6 = vcmask 1043456   ;;  %s798_s14 = sadd.s32 1, %s2312_s14   ;;  %s2312_s14 = sphi %s2857_s14, %s798_s14  }
 0x39c   : >> { %1576 = vmatprep.subr.bf16.mxu0 %v2342_v44  ;;  %1578 = vmatprep.mubr.msk.bf16.mxu0 %vm2343_vm4, %v2342_v44  ;;  %s804_s0 = scalar_lea.vmem [#allocation3], %s2863_s13  ;;  %s801_s16 = scalar_lea.vmem [#allocation2], %s2863_s13 }
 0x39d   : >> { %1582 = vmatprep.subr.bf16.mxu1 %v2342_v44  ;;  %1584 = vmatprep.mubr.msk.bf16.mxu1 %vm2343_vm4, %v2342_v44  ;;  %v805_v45 = vld [vmem:[%s804_s0] sm:$0xf]  ;;  %s807_s22 = scalar_lea.vmem [#allocation4], %s2863_s13  ;;  %s925_s30 = scalar_lea.vmem [#allocation5], %s2863_s13 }
 0x39e   : >> { %v814_v46 = vsel %vm809_vm5, %v805_v45, 0  ;;  %v802_v47 = vld [vmem:[%s801_s16] sm:$0xf]  ;;  %p795_p2 = scmp.ge.s32.totalorder %s798_s14, 4  }
 0x39f   : >> { %1577 = vmatpush3.bf16.xpose.msra.mxu0 %v814_v46  ;;  %s2344_s2 = smov (%p795_p2), 8   ;;  %v1832_v19 = vld [vmem:[#allocation15] sm:$0xff] (%p795_p2)   ;;  %s2345_s17 = smov (%p795_p2), 24   ;;  %v1833_v20 = vld [vmem:[#allocation15 + $0x8] sm:$0xff] (%p795_p2)   ;;  %vm962_vm7 = vcmask (%p795_p2), 130048   ;;  %vm965_vm8 = vcmask (%p795_p2), 195584  }
 0x3a0   : > { %1604 = vmatprep.subr.bf16.mxu0 (%p795_p2), %v2329_v6  ;;  %s2346_s15 = smov (%p795_p2), 16   ;;  %v1522_v26 = vld [vmem:[#allocation17] ss:$0 sm:$0xff] (%p795_p2)  ;;  %v932_v27 = vld [vmem:[%s2797_s23] sm:$0xff] (%p795_p2)  ;;  %s3022_s23 = sld [smem:[#allocation36_spill]] (%p795_p2) }
 0x3a1   : >> { %v808_v54 = vld [vmem:[%s807_s22] sm:$0xf]  ;;  %v1835_v38 = vld [vmem:[#allocation21 + $0x8] sm:$0xff] (%p795_p2)   ;;  %v1836_v39 = vld [vmem:[#allocation24] sm:$0xff] (%p795_p2)   ;;  %s1265_s14 = sshll.u32 (%p795_p2), %s2855_s20, 4  ;;  %s3023_s16 = sld [smem:[#allocation42_spill]] (%p795_p2)  ;;  %s2919_s14 = int_to_ptr.vmem [resolvable:$true] %s1265_s14 }
 0x3a2   : >> { %v878_v55 = vsel %vm876_vm6, %v808_v54, 0  ;;  %v1834_v37 = vld [vmem:[#allocation21] sm:$0xff] (%p795_p2)   ;;  %p3024_p10 = scmp.ne.s32.totalorder (%p795_p2), %s3003_s3, 0 }
 0x3a3   : >> { %1583 = vmatpush3.bf16.msra.mxu1 %v878_v55 }
 0x3a4   : > { %1588 = vmatprep.subr.bf16.mxu1 (%p795_p2), %v2329_v6 }
 0x3a6   : >> { %1579 = vmatmul.mubr.msk.bf16.vlgmr.msra.gmra.mrb[0].mxu0 %vm809_vm5, %v802_v47  ;;  %s1542_s24 = sshll.u32 (%p795_p2), %s3022_s23, 7 }
 0x3a7   : > { %1620 = vmatprep.mubr.msk.bf16.mxu0 (%p795_p2), %vm2330_vm1, %v2329_v6  ;;  %1605 = vmatpush3.bf16.msra.mxu0 (%p795_p2), %v1836_v39  ;;  %s2917_s22 = scalar_lea.hbm (%p795_p2), %s3023_s16, %s1542_s24 }
 0x3a8   : > { %1606 = vmatprep.subr.bf16.mxu0 (%p795_p2), %v2329_v6 }
 0x479   : >> { %v850_v48 = vpop.f32.mrb[0].mxu0 }
 0x47a   : >> { %v856_v49 = vsel %vm622_vm2, %v850_v48, -1e+30  ;;  %v1580_v50 = vpop.f32.mrb[1].mxu0 }
 0x47b   : >> { %v853_v51 = vpop.f32.mrb[2].mxu0  ;;  %v857_v52 = vsel %vm809_vm5, %v856_v49, -inf  ;;  %v1526_v50 = vld [vmem:[#allocation18] ss:$0 sm:$0xff] (%p795_p2) }
 0x47c   : >> { %858 = vmax.xlane.f32.xlu0 %v857_v52  ;;  %v1581_v53 = vpop.f32.mrb[3].mxu0  ;;  %v1527_v52 = vld [vmem:[#allocation20] ss:$0 sm:$0xff] (%p795_p2) }
 0x509   : >> { %v859_v56 = vpop.xlane.xlu0 %858 }
 0x50a   : >> { %v860_v57 = vmax.f32 %v859_v56, -1e+30  ;;  %v1837_v56 = vld [vmem:[#allocation24 + $0x8] sm:$0xff] (%p795_p2)  }
 0x50b   : > { %1607 = vmatpush3.bf16.msra.mxu0 (%p795_p2), %v1837_v56 }
 0x50c   : >> { %v864_v58 = vsub.f32 %v856_v49, %v860_v57  ;;  %v861_v63 = vsub.f32 -1e+30, %v860_v57  ;;  %1608 = vmatprep.subr.bf16.mxu0 (%p795_p2), %v2329_v6  ;;  %v1838_v57 = vld [vmem:[#allocation24 + $0x10] sm:$0xff] (%p795_p2)  }
 0x50e   : >> { %v865_v59 = vmul.f32 1.442695, %v864_v58  ;;  %v862_v0 = vmul.f32 1.442695, %v861_v63  ;;  %v1839_v58 = vld [vmem:[#allocation24 + $0x18] sm:$0xff] (%p795_p2)  }
 0x50f   : > { %1609 = vmatpush3.bf16.msra.mxu0 (%p795_p2), %v1838_v57  ;;  %v1528_v63 = vld [vmem:[#allocation23] ss:$0 sm:$0xff] (%p795_p2) }
 0x510   : >> { %1823 = vpow2.f32 %v865_v59  ;;  %1610 = vmatprep.subr.bf16.mxu0 (%p795_p2), %v2329_v6  ;;  %v1840_v59 = vld [vmem:[#allocation24 + $0x20] sm:$0xff] (%p795_p2)  }
 0x511   : >> { %1825 = vpow2.f32 %v862_v0 }
 0x513   : > { %1611 = vmatpush3.bf16.msra.mxu0 (%p795_p2), %v1839_v58 }
 0x514   : > { %1612 = vmatprep.subr.bf16.mxu0 (%p795_p2), %v2329_v6 }
 0x517   : > { %1613 = vmatpush3.bf16.msra.mxu0 (%p795_p2), %v1840_v59 }
 0x518   : > { %1614 = vmatprep.subr.bf16.mxu0 (%p795_p2), %v2329_v6 }
 0x51a   : >> { %v1824_v60 = vpop.eup %1823 }
 0x51b   : >> { %v868_v61 = vsel %vm809_vm5, %v1824_v60, 0.0  ;;  %v872_v62 = vpack.c.bf16 %v1824_v60, %v1824_v60  ;;  %v1826_v1 = vpop.eup %1825  ;;  %v1841_v60 = vld [vmem:[#allocation24 + $0x28] sm:$0xff] (%p795_p2)  }
 0x51c   : >> { %869 = vadd.xlane.f32.xlu0 %v868_v61  ;;  %v867_v3 = vmul.f32 0.0, %v1826_v1  ;;  %1615 = vmatpush3.bf16.msra.mxu0 (%p795_p2), %v1841_v60  ;;  %v1842_v61 = vld [vmem:[#allocation24 + $0x30] sm:$0xff] (%p795_p2)  }
 0x51d   : >> { %1585 = vmatmul.mubr.msk.bf16.vlgmr.msra.gmra.mrb[0].mxu1 %vm809_vm5, %v872_v62  ;;  %1616 = vmatprep.subr.bf16.mxu0 (%p795_p2), %v2329_v6  ;;  %v1843_v62 = vld [vmem:[#allocation24 + $0x38] sm:$0xff] (%p795_p2)  }
 0x51e   : > { %1592 = vmatprep.mubr.msk.bf16.mxu1 (%p795_p2), %vm2330_vm1, %v2329_v6  ;;  %1589 = vmatpush3.bf16.msra.mxu1 (%p795_p2), %v1832_v19 }
 0x51f   : > { %1590 = vmatprep.subr.bf16.mxu1 (%p795_p2), %v2329_v6 }
 0x520   : > { %1617 = vmatpush3.bf16.msra.mxu0 (%p795_p2), %v1842_v61 }
 0x521   : > { %1618 = vmatprep.subr.bf16.mxu0 (%p795_p2), %v2329_v6 }
 0x522   : > { %1591 = vmatpush3.bf16.msra.mxu1 (%p795_p2), %v1833_v20 }
 0x523   : > { %1596 = vmatprep.subr.bf16.mxu1 (%p795_p2), %v2329_v6 }
 0x524   : > { %1619 = vmatpush3.bf16.msra.mxu0 (%p795_p2), %v1843_v62 }
 0x5a9   : >> { %v870_v2 = vpop.xlane.xlu0 %869 }
 0x5aa   : >> { %v871_v4 = vadd.f32 %v870_v2, %v867_v3 }
 0x5ac   : >> { %1827 = vrcp.f32 %v871_v4 }
 0x5b6   : >> { %v1828_v11 = vpop.eup %1827 }
 0x5f0   : >> { %v914_v5 = vpop.f32.mrb[0].mxu1 }
 0x5f1   : >> { %v920_v9 = vadd.f32 %v914_v5, %v867_v3  ;;  %v1586_v10 = vpop.f32.mrb[1].mxu1  ;;  %797 = sbr.rel (!%p795_p2) target bundleno = 923 (0x39b), region = 188 }
 0x5f2   : >> { %v917_v12 = vpop.f32.mrb[2].mxu1 }
 0x5f3   : >> { %v922_v13 = vmul.f32 %v1828_v11, %v920_v9  ;;  %v1587_v14 = vpop.f32.mrb[3].mxu1 }
 0x5f5   : >> { %v923_v15 = vpack.c.bf16 %v922_v13, %v922_v13 }
 0x5f7   : >> { %926 = vst.msk [vmem:[%s925_s30] sm:$0xf] %vm723_vm3, %v923_v15  ;;  %s1252_s30 = scalar_lea.sflag (%p795_p2), [#allocation8], %s2791_s19 }
 0x5fe   : > { %v1829_v16 = vld [vmem:[#allocation5 + $0x4] ss:$0 sps:$4 sm:$0xff]   ;;  %v1830_v17 = vld [vmem:[#allocation5 + $0x8] ss:$0 sps:$4 sm:$0xff]   ;;  %v1831_v18 = vld [vmem:[#allocation5 + $0xc] ss:$0 sps:$4 sm:$0xff]  }
 0x5ff   : > { %946 = vrot.lane.b32.xlu0 %v1829_v16, %s2344_s2  ;;  %956 = vrot.lane.b32.xlu1 %v1831_v18, %s2345_s17  ;;  %v933_v8 = vld [vmem:[#allocation5] sm:$0xf]  ;;  %s2214_s2 = scalar_lea.vmem %s2919_s14, 128  ;;  %s2347_s17 = smov [#allocation27]  }
 0x600   : > { %p2215_p0 = scmp.ne.s32.totalorder %s2919_s14, %s2214_s2 }
 0x602   : > { %p2216_p11 = pnand %p2215_p0, %p3024_p10 }
 0x603   : > { %951 = vrot.lane.b32.xlu0 %v1830_v17, %s2346_s15  ;;  %v1532_v17 = vld [vmem:[#allocation26] ss:$0 sm:$0xff]  ;;  %s2218_s15 = sshll.u32 %s2347_s17, 4  ;;  %s2219_s15 = int_to_ptr.vmem [resolvable:$false] %s2218_s15 }
 0x604   : > { %p2217_p12 = pneg %p2216_p11  ;;  %s2220_s23 = scalar_lea.vmem %s2219_s15, 256 }
 0x605   : > { %p2221_p8 = scmp.lt.s32.totalorder %s2919_s14, %s2219_s15  ;;  %p2222_p5 = scmp.lt.s32.totalorder %s2220_s23, %s2214_s2 }
 0x607   : > { %p2223_p7 = por %p2222_p5, %p2221_p8 }
 0x609   : > { %p2224_p6 = pnand %p2223_p7, %p2217_p12 }
 0x671   : > { %v947_v7 = vpop.permute.xlu0 %946  ;;  %v957_v21 = vpop.permute.xlu1 %956 }
 0x672   : > { %v961_v22 = vsel %vm809_vm5, %v933_v8, %v947_v7 }
 0x675   : > { %v952_v23 = vpop.permute.xlu0 %951 }
 0x676   : > { %v964_v24 = vsel %vm962_vm7, %v961_v22, %v952_v23 }
 0x677   : > { %v967_v25 = vsel %vm965_vm8, %v964_v24, %v957_v21 }
 0x678   : > { %1593 = vmatmul.mubr.msk.bf16.vlgmr.msra.gmra.mrb[0].mxu1 %vm624_vm0, %v967_v25 }
 0x679   : > { %1600 = vmatprep.mubr.msk.bf16.mxu1 %vm2330_vm1, %v2329_v6  ;;  %1597 = vmatpush3.bf16.msra.mxu1 %v1834_v37 }
 0x67a   : > { %1598 = vmatprep.subr.bf16.mxu1 %v2329_v6 }
 0x67d   : > { %1599 = vmatpush3.bf16.msra.mxu1 %v1835_v38 }
 0x74b   : > { %v1026_v28 = vpop.f32.mrb[0].mxu1 }
 0x74c   : > { %v1027_v29 = vadd.f32 %v1522_v26, %v1026_v28  ;;  %v1594_v30 = vpop.f32.mrb[1].mxu1 }
 0x74d   : > { %v1029_v31 = vpop.f32.mrb[2].mxu1 }
 0x74e   : > { %v2894_v32 = vadd.f32 %v1027_v29, %v932_v27  ;;  %v1595_v33 = vpop.f32.mrb[3].mxu1 }
 0x750   : > { %v1033_v34 = vsel %vm624_vm0, %v2894_v32, 0.0  ;;  %v1037_v35 = vmul.f32 %v2894_v32, %v2894_v32 }
 0x751   : > { %1034 = vadd.xlane.f32.xlu1 %v1033_v34 }
 0x752   : > { %v1038_v36 = vsel %vm624_vm0, %v1037_v35, 0.0 }
 0x753   : > { %1039 = vadd.xlane.f32.xlu0 %v1038_v36 }
 0x7de   : > { %v1035_v40 = vpop.xlane.xlu1 %1034 }
 0x7df   : > { %v1036_v41 = vmul.f32 0.03125, %v1035_v40 }
 0x7e0   : > { %v1040_v42 = vpop.xlane.xlu0 %1039 }
 0x7e1   : > { %v1042_v43 = vmul.f32 %v1036_v41, %v1036_v41  ;;  %v1041_v44 = vmul.f32 0.03125, %v1040_v42  ;;  %v1045_v48 = vsub.f32 %v2894_v32, %v1036_v41 }
 0x7e3   : > { %v1043_v45 = vsub.f32 %v1041_v44, %v1042_v43 }
 0x7e5   : > { %v1044_v46 = vmax.f32 %v1043_v45, 0.0 }
 0x7e7   : > { %v1046_v47 = vadd.f32 1e-05, %v1044_v46 }
 0x7e9   : > { %1844 = vrsqrt.f32 %v1046_v47 }
 0x7f3   : > { %v1845_v49 = vpop.eup %1844 }
 0x7f4   : > { %v1048_v51 = vmul.f32 %v1845_v49, %v1045_v48 }
 0x7f6   : > { %v1055_v53 = vmul.f32 %v1526_v50, %v1048_v51 }
 0x7f8   : > { %v1062_v54 = vadd.f32 %v1527_v52, %v1055_v53 }
 0x7fa   : > { %v1063_v55 = vpack.c.bf16 %v1062_v54, %v1062_v54 }
 0x7fc   : > { %1601 = vmatmul.mubr.msk.bf16.vlgmr.msra.gmra.mrb[4].mxu1 %vm624_vm0, %v1063_v55 }
 0x8cf   : > { %v1123_v0 = vpop.f32.mrb[4].mxu1 }
 0x8d0   : > { %v1124_v1 = vadd.f32 %v1528_v63, %v1123_v0  ;;  %v1602_v2 = vpop.f32.mrb[5].mxu1 }
 0x8d1   : > { %v1126_v3 = vpop.f32.mrb[6].mxu1 }
 0x8d2   : > { %v1130_v4 = vmul.f32 0.044715, %v1124_v1  ;;  %v1603_v5 = vpop.f32.mrb[7].mxu1  ;;  %v1129_v14 = vmul.f32 0.5, %v1124_v1 }
 0x8d4   : > { %v1131_v9 = vmul.f32 %v1130_v4, %v1124_v1 }
 0x8d6   : > { %v1132_v10 = vmul.f32 %v1131_v9, %v1124_v1 }
 0x8d8   : > { %v1133_v11 = vadd.f32 %v1132_v10, %v1124_v1 }
 0x8da   : > { %v1134_v12 = vmul.f32 0.7978846, %v1133_v11 }
 0x8dc   : > { %1846 = vtanh.f32 %v1134_v12 }
 0x8e6   : > { %v1847_v13 = vpop.eup %1846 }
 0x8e7   : > { %v1136_v15 = vadd.f32 1.0, %v1847_v13 }
 0x8e9   : > { %v1137_v6 = vmul.f32 %v1136_v15, %v1129_v14 }
 0x8eb   : > { %v1138_v16 = vpack.c.bf16 %v1137_v6, %v1137_v6 }
 0x8ed   : > { %1621 = vmatmul.mubr.bf16.vlgmr.msra.gmra.mrb[0].mxu0 %v1138_v16 }
 0x9c0   : > { %v1243_v18 = vpop.f32.mrb[0].mxu0 }
 0x9c1   : > { %v1244_v19 = vadd.f32 %v1532_v17, %v1243_v18  ;;  %v1622_v20 = vpop.f32.mrb[1].mxu0 }
 0x9c2   : > { %v1246_v7 = vpop.f32.mrb[2].mxu0 }
 0x9c3   : > { %v1249_v8 = vadd.f32 %v1244_v19, %v2894_v32  ;;  %v1623_v21 = vpop.f32.mrb[3].mxu0 }
 0x9c5   : > { %1250 = vst.msk [vmem:[%s2855_s20] sm:$0xff] %vm624_vm0, %v1249_v8 }
 0x9c6   : > { %2227 = shalt.err (!%p2224_p6)
}
 0x9c7   : > { %s2228_s19 = scalar_lea.hbm %s2917_s22, 128  ;;  %s2232_s13 = scalar_lea.hbm %s3023_s16, 256 }
 0x9c8   : > { %p2229_p9 = scmp.ne.s32.totalorder %s2917_s22, %s2228_s19  ;;  %p2233_p1 = scmp.lt.u32.totalorder %s2917_s22, %s3023_s16 }
 0x9c9   : > { %p2234_p3 = scmp.lt.u32.totalorder %s2232_s13, %s2228_s19  ;;  %p2236_p0 = scmp.lt.u32.totalorder %s2228_s19, %s2917_s22 }
 0x9ca   : > { %p2230_p4 = pnand %p2229_p9, %p3024_p10 }
 0x9cb   : > { %p2235_p2 = por %p2234_p3, %p2233_p1 }
 0x9cc   : > { %p2231_p13 = pneg %p2230_p4 }
 0x9cd   : > { %p2237_p11 = por %p2236_p0, %p2235_p2 }
 0x9cf   : > { %p2238_p12 = pnand %p2237_p11, %p2231_p13 }
 0x9d1   : > { %2241 = shalt.err (!%p2238_p12)
}
 0x9d2   : > { %1674 = dma.vmem_to_hbm [thread:$0]  (%p3024_p10), %s2919_s14, 128, %s2917_s22, %s1252_s30  }
 0x9d3 PF: > { %s1277_s2 = sand.u32 1, %s2296_s25   ;;  %p3025_p8 = scmp.ne.s32.totalorder %s3004_s21, 0 }
 0x9d4   : > { %p3026_p5 = scmp.ge.s32.totalorder %s2308_s28, 2  ;;  %s1278_s15 = scalar_lea.sflag [#allocation8], %s1277_s2 }
 0x9d6   : > { %p1718_p7 = pnand %p3026_p5, %p3025_p8 }
 0x9d8   : > { %2291 = dma.done.wait (!%p1718_p7), %s1278_s15, 128  }
 0x9d9   : > { %2293 = vsyncadd (!%p1718_p7), %s1278_s15, 4294967168  ;;  %p32_p6 = scmp.ge.s32.totalorder %s2715_s18, 4   ;;  %s3027_s25 = smov %s2300_s26 }
 0x9da   : > { %s3028_s26 = smov %s2304_s27  ;;  %s3029_s27 = smov %s2726_s29 }
 0x9db   : > { %s3030_s28 = smov %s2715_s18  ;;  %34 = sbr.rel (!%p32_p6) target bundleno = 17 (0x11), region = 199 }
 0x9e2   :  { %1283 = vsyncpa [#allocation7], 1 }
 0x9e3   :  { %1285 = vsyncpa [#allocation7 + $0x1], 1 }
 0x9e4   :  { %1286 = vsyncpa [#allocation10], 1 }
 0x9e5   :  { %1287 = vsyncpa [#allocation13], 1 }
 0x9e6   :  { %1288 = vsyncpa [#allocation16], 1 }
 0x9e7   :  { %1289 = vsyncpa [#allocation19], 1 }
 0x9e8   :  { %1290 = vsyncpa [#allocation22], 1 }
 0x9e9   :  { %1291 = vsyncpa [#allocation25], 1 }
 0x9ea   :  { %1292 = vsyncpa [#allocation8], 1 }
 0x9eb   :  { %1294 = vsyncpa [#allocation8 + $0x1], 1 }

</bundles_post_ra>
